<compile_context>
chip_gen: v6e
topology: v6e:2x2x1
jax: 0.10.0
libtpu: 0.0.40
codegen_flags: <defaults>
</compile_context>

<pallas_src>
import jax
import jax.numpy as jnp
from jax.experimental import pallas as pl
from jax.experimental.pallas import tpu as pltpu


def _sepconv_kernel(xm_ref, xh_ref, w_ref, b_ref, o_ref, acc_ref):
    # xm_ref:  (1, tile_h, Wp, Cin)  main padded rows [h*tile_h, h*tile_h + tile_h)
    # xh_ref:  (1, 2, Wp, Cin)       halo padded rows [h*tile_h + tile_h, ... + 2)
    # w_ref:   (9, Cin, Cout)        fused depthwise*pointwise weight per tap
    # b_ref:   (1, Cout)             fused bias
    # o_ref:   (1, tile_h, W*Cout)   lane-dense output block
    # acc_ref: (tile_h, W, Cout)     f32 accumulator scratch
    tile_h, Wp, Cin = xm_ref.shape[1], xm_ref.shape[2], xm_ref.shape[3]
    W = Wp - 2
    Cout = w_ref.shape[2]

    acc_ref[...] = jnp.zeros_like(acc_ref)

    # 3 horizontally shifted windows (read once each, straight from the input block);
    # per window, 3 row offsets accumulate via small MXU dots into the f32 accumulator.
    for kw in range(3):
        xm_kw = xm_ref[0, :, kw:kw + W, :]            # (tile_h, W, Cin)
        xh_kw = xh_ref[0, :, kw:kw + W, :]            # (2, W, Cin)
        for kh in range(3):
            w_t = w_ref[kh * 3 + kw]                  # (Cin, Cout) fused dw*pw tap
            if tile_h > kh:
                # window rows kh..tile_h-1 live in the main block -> out rows [0, tile_h-kh)
                zm = jnp.dot(xm_kw[kh:].reshape((tile_h - kh) * W, Cin), w_t,
                             preferred_element_type=jnp.float32)
                acc_ref[0:tile_h - kh] += zm.reshape(tile_h - kh, W, Cout)
            if kh:
                # window rows tile_h..tile_h+kh-1 live in the halo block
                #   -> out rows [tile_h-kh, tile_h)
                zh = jnp.dot(xh_kw[:kh].reshape(kh * W, Cin), w_t,
                             preferred_element_type=jnp.float32)
                acc_ref[tile_h - kh:] += zh.reshape(kh, W, Cout)

    out = acc_ref[...] + b_ref[0, :]
    # Lane-dense store: W*Cout packed onto the lane axis (multiple of 128 here).
    o_ref[...] = out.reshape(1, tile_h, W * Cout).astype(o_ref.dtype)


def _padded_tile_bytes(shape, itemsize):
    """VMEM footprint of a tile with the last dim padded to 128 lanes, 2nd-to-last to 8."""
    s = list(shape)
    if len(s) >= 1:
        s[-1] = -(-s[-1] // 128) * 128
    if len(s) >= 2:
        s[-2] = -(-s[-2] // 8) * 8
    n = 1
    for d in s:
        n *= d
    return n * itemsize


def _tile_vmem_bytes(tile_h, W, Cin, Cout, itemsize):
    Wp = W + 2
    main = _padded_tile_bytes((tile_h, Wp, Cin), itemsize)
    halo = _padded_tile_bytes((2, Wp, Cin), itemsize)
    outb = _padded_tile_bytes((tile_h, W * Cout), itemsize)
    wgt = _padded_tile_bytes((9, Cin, Cout), 4) + _padded_tile_bytes((1, Cout), 4)
    acc = _padded_tile_bytes((tile_h, W, Cout), 4)
    tmp = 2 * _padded_tile_bytes((tile_h, W, max(Cin, Cout)), 4)  # transient dot values
    # double-buffered pipeline copies of every in/out block + resident scratch/temps
    return 2 * (main + halo + outb + wgt) + acc + tmp


def _vmem_caps():
    """(physical VMEM bytes, working-set budget) with a conservative v7x fallback."""
    try:
        cap = int(getattr(pltpu.get_tpu_info(), "vmem_capacity_bytes", 64 * 2**20))
    except Exception:
        cap = 64 * 2**20
    # ~40 MiB on 128 MiB parts (v5e/v6e), ~cap/3 (~21 MiB) on v7x's 64 MiB per core.
    budget = min(40 * 2**20, cap // 3)
    return cap, budget


def _pick_tile_h(N, H, W, Cin, Cout, itemsize, budget_bytes):
    """Largest valid H tile that fits the VMEM budget; raises if none fits."""
    # tile_h must divide H, be even (merged 2-row halo block), and be a multiple of 8
    # or H itself (output-block sublane constraint).
    cands = [d for d in range(2, H + 1)
             if H % d == 0 and d % 2 == 0 and (d % 8 == 0 or d == H)]
    if not cands:
        raise ValueError(f"H={H}: need an even divisor that is a multiple of 8 or H itself")
    fitting = [d for d in cands if _tile_vmem_bytes(d, W, Cin, Cout, itemsize) <= budget_bytes]
    if not fitting:
        raise ValueError(
            f"no H tile fits the VMEM budget ({budget_bytes} bytes); "
            "reduce W/channels or raise the budget")
    # v7x megacore: prefer a tiling that yields >= 2 parallel grid steps when possible.
    balanced = [d for d in fitting if N * (H // d) >= 2]
    return max(balanced or fitting)


def separable_conv2d(x_nchw, dw_weight, dw_bias, pw_weight, pw_bias, *, tile_h=None):
    """x_nchw: (N, C, H, W); dw_weight: (C, 1, 3, 3); pw_weight: (Cout, C, 1, 1)."""
    N, Cin, H, W = x_nchw.shape
    Cout = pw_weight.shape[0]
    Wp = W + 2
    itemsize = jnp.dtype(x_nchw.dtype).itemsize

    cap, budget = _vmem_caps()
    if tile_h is None:
        tile_h = _pick_tile_h(N, H, W, Cin, Cout, itemsize, budget)
    assert H % tile_h == 0, "tile_h must divide H"
    assert tile_h % 2 == 0, "tile_h must be even (merged 2-row halo block)"
    assert tile_h % 8 == 0 or tile_h == H, "tile_h must be a multiple of 8 or equal H"
    n_h = H // tile_h

    # TODO(synk): keep the surrounding model NHWC end-to-end and fold the 1-pixel zero
    # pad into in-kernel halo masking to drop these extra HBM passes.
    x = jnp.transpose(x_nchw, (0, 2, 3, 1))                  # NCHW -> NHWC
    x_pad = jnp.pad(x, ((0, 0), (1, 1), (1, 1), (0, 0)))     # (N, H+2, W+2, Cin)

    # Fused weights/bias in f32 (module dtype is f32; keep full-precision MXU path).
    f32 = jnp.float32
    dw = dw_weight.reshape(Cin, 9).astype(f32)               # dw[c, kh*3+kw]
    pw_t = pw_weight.reshape(Cout, Cin).T.astype(f32)        # (Cin, Cout)
    w_fused = dw.T[:, :, None] * pw_t[None, :, :]            # (9, Cin, Cout)
    b_fused = (pw_bias.astype(f32) + dw_bias.astype(f32) @ pw_t).reshape(1, Cout)

    est = _tile_vmem_bytes(tile_h, W, Cin, Cout, itemsize)
    vmem_limit = int(min(cap // 2, max(16 * 2**20, 2 * est)))

    flops = 2 * N * H * W * 9 * Cin * Cout
    bytes_accessed = int((N * (H + 2) * Wp * Cin + N * H * W * Cout) * itemsize
                         + (9 * Cin * Cout + Cout) * 4)

    half = tile_h // 2
    out_flat = pl.pallas_call(
        _sepconv_kernel,
        out_shape=jax.ShapeDtypeStruct((N, H, W * Cout), x_nchw.dtype),
        grid_spec=pltpu.PrefetchScalarGridSpec(
            num_scalar_prefetch=0,
            grid=(N, n_h),
            in_specs=[
                # main rows: padded rows [h*tile_h, h*tile_h + tile_h)
                pl.BlockSpec((1, tile_h, Wp, Cin), lambda n, h: (n, h, 0, 0)),
                # merged 2-row halo: padded rows [(h+1)*tile_h, (h+1)*tile_h + 2)
                pl.BlockSpec((1, 2, Wp, Cin), lambda n, h: (n, (h + 1) * half, 0, 0)),
                # fused per-tap weights / bias: constant blocks, resident in VMEM
                pl.BlockSpec((9, Cin, Cout), lambda n, h: (0, 0, 0)),
                pl.BlockSpec((1, Cout), lambda n, h: (0, 0)),
            ],
            out_specs=pl.BlockSpec((1, tile_h, W * Cout), lambda n, h: (n, h, 0)),
            scratch_shapes=[pltpu.VMEM((tile_h, W, Cout), jnp.float32)],
        ),
        compiler_params=pltpu.CompilerParams(
            dimension_semantics=("parallel", "parallel"),
            vmem_limit_bytes=vmem_limit,
        ),
        cost_estimate=pl.CostEstimate(flops=flops, transcendentals=0,
                                      bytes_accessed=bytes_accessed),
    )(x_pad, x_pad, w_fused, b_fused)

    # (N, H, W*Cout) -> (N, H, W, Cout) is a free contiguous reshape; back to NCHW.
    out_nhwc = out_flat.reshape(N, H, W, Cout)
    return jnp.transpose(out_nhwc, (0, 3, 1, 2))


def _reference(x_nchw, dw_weight, dw_bias, pw_weight, pw_bias):
    C = x_nchw.shape[1]
    dn = ("NCHW", "OIHW", "NCHW")
    y = jax.lax.conv_general_dilated(
        x_nchw, dw_weight, window_strides=(1, 1), padding=((1, 1), (1, 1)),
        dimension_numbers=dn, feature_group_count=C)
    y = y + dw_bias[None, :, None, None]
    z = jax.lax.conv_general_dilated(
        y, pw_weight, window_strides=(1, 1), padding=((0, 0), (0, 0)),
        dimension_numbers=dn)
    z = z + pw_bias[None, :, None, None]
    return z


if __name__ == "__main__":
    key = jax.random.PRNGKey(0)

    # (N, Cin, Cout, H, W, tile_h): the first config forces 2 H-tiles so the halo
    # block and multi-step pipeline are exercised; others use the auto tile picker.
    configs = [
        (2, 4, 8, 16, 16, 8),
        (2, 4, 8, 16, 16, None),
        (1, 8, 16, 16, 16, None),
    ]

    for idx, (N, Cin, Cout, H, W, th) in enumerate(configs):
        k = jax.random.fold_in(key, idx)
        k_x, k_dw, k_dwb, k_pw, k_pwb = jax.random.split(k, 5)

        x = jax.random.normal(k_x, (N, Cin, H, W), dtype=jnp.float32)
        # nn.Conv2d(Cin, Cin, 3, padding=1, groups=Cin): weight (Cin,1,3,3), bias (Cin,)
        dw_w = 0.1 * jax.random.normal(k_dw, (Cin, 1, 3, 3), dtype=jnp.float32)
        dw_b = 0.1 * jax.random.normal(k_dwb, (Cin,), dtype=jnp.float32)
        # nn.Conv2d(Cin, Cout, 1): weight (Cout,Cin,1,1), bias (Cout,)
        pw_w = 0.1 * jax.random.normal(k_pw, (Cout, Cin, 1, 1), dtype=jnp.float32)
        pw_b = 0.1 * jax.random.normal(k_pwb, (Cout,), dtype=jnp.float32)

        out = jax.block_until_ready(
            separable_conv2d(x, dw_w, dw_b, pw_w, pw_b, tile_h=th))
        ref = jax.block_until_ready(_reference(x, dw_w, dw_b, pw_w, pw_b))

        assert out.shape == (N, Cout, H, W)
        assert jnp.allclose(out, ref, atol=1e-4, rtol=1e-4), f"mismatch in config {idx}"

    print("KERNEL_OK")
</pallas_src>

<mosaic_0001>
module attributes {stable_mosaic.version = 11 : i64} {
  func.func @_sepconv_kernel(%arg0: i32, %arg1: i32, %arg2: memref<1x8x18x4xf32, #tpu.memory_space<vmem>>, %arg3: memref<1x2x18x4xf32, #tpu.memory_space<vmem>>, %arg4: memref<9x4x8xf32, #tpu.memory_space<vmem>>, %arg5: memref<1x8xf32, #tpu.memory_space<vmem>>, %arg6: memref<1x8x128xf32, #tpu.memory_space<vmem>>, %arg7: memref<8x16x8xf32, #tpu.memory_space<vmem>>) attributes {dimension_semantics = [#tpu.dimension_semantics<parallel>, #tpu.dimension_semantics<parallel>], iteration_bounds = array<i64: 2, 2>, scalar_prefetch = 0 : i64, scratch_operands = 1 : i64, tpu.core_type = #tpu.core_type<tc>, window_params = [{transform_indices = @transform_0, window_bounds = array<i64: 1, 8, 18, 4>}, {transform_indices = @transform_1, window_bounds = array<i64: 1, 2, 18, 4>}, {pipeline_mode = #tpu.pipeline_mode<synchronous>, transform_indices = @transform_2, window_bounds = array<i64: 9, 4, 8>}, {pipeline_mode = #tpu.pipeline_mode<synchronous>, transform_indices = @transform_3, window_bounds = array<i64: 1, 8>}, {transform_indices = @transform_4, window_bounds = array<i64: 1, 8, 128>}]} {
    %cst = arith.constant 0.000000e+00 : f32
    %0 = vector.broadcast %cst : f32 to vector<8x16x8xf32>
    %c0 = arith.constant 0 : index
    %c0_0 = arith.constant 0 : index
    %c0_1 = arith.constant 0 : index
    %1 = vector.load %arg7[%c0, %c0_0, %c0_1] : memref<8x16x8xf32, #tpu.memory_space<vmem>>, vector<8x16x8xf32>
    tpu.vector_store %arg7[%c0, %c0_0, %c0_1], %0 {strides = array<i32>} : memref<8x16x8xf32, #tpu.memory_space<vmem>>, vector<8x16x8xf32>,
    %c0_2 = arith.constant 0 : index
    %c0_3 = arith.constant 0 : index
    %c0_4 = arith.constant 0 : index
    %c0_5 = arith.constant 0 : index
    %2 = vector.load %arg2[%c0_2, %c0_3, %c0_4, %c0_5] : memref<1x8x18x4xf32, #tpu.memory_space<vmem>>, vector<1x8x16x4xf32>
    %3 = vector.shape_cast %2 : vector<1x8x16x4xf32> to vector<8x16x4xf32>
    %c0_6 = arith.constant 0 : index
    %c0_7 = arith.constant 0 : index
    %c0_8 = arith.constant 0 : index
    %c0_9 = arith.constant 0 : index
    %4 = vector.load %arg3[%c0_6, %c0_7, %c0_8, %c0_9] : memref<1x2x18x4xf32, #tpu.memory_space<vmem>>, vector<1x2x16x4xf32>
    %5 = vector.shape_cast %4 : vector<1x2x16x4xf32> to vector<2x16x4xf32>
    %c0_10 = arith.constant 0 : index
    %c0_11 = arith.constant 0 : index
    %c0_12 = arith.constant 0 : index
    %6 = vector.load %arg4[%c0_10, %c0_11, %c0_12] : memref<9x4x8xf32, #tpu.memory_space<vmem>>, vector<1x4x8xf32>
    %7 = vector.shape_cast %6 : vector<1x4x8xf32> to vector<4x8xf32>
    %8 = vector.shape_cast %3 : vector<8x16x4xf32> to vector<128x4xf32>
    %cst_13 = arith.constant dense<0.000000e+00> : vector<128x8xf32>
    %9 = tpu.matmul %8, %7, %cst_13 {dimension_numbers = #tpu.dot_dimension_numbers<[1], [0], [0], [1], [0, 0, 1, 1], [], []>} : vector<128x4xf32>, vector<4x8xf32>, vector<128x8xf32> -> vector<128x8xf32>
    %c0_14 = arith.constant 0 : index
    %c0_15 = arith.constant 0 : index
    %c0_16 = arith.constant 0 : index
    %10 = vector.load %arg7[%c0_14, %c0_15, %c0_16] : memref<8x16x8xf32, #tpu.memory_space<vmem>>, vector<8x16x8xf32>
    %11 = vector.shape_cast %9 : vector<128x8xf32> to vector<8x16x8xf32>
    %12 = arith.addf %10, %11 : vector<8x16x8xf32>
    %c0_17 = arith.constant 0 : index
    %c0_18 = arith.constant 0 : index
    %c0_19 = arith.constant 0 : index
    %13 = vector.load %arg7[%c0_17, %c0_18, %c0_19] : memref<8x16x8xf32, #tpu.memory_space<vmem>>, vector<8x16x8xf32>
    tpu.vector_store %arg7[%c0_17, %c0_18, %c0_19], %12 {strides = array<i32>} : memref<8x16x8xf32, #tpu.memory_space<vmem>>, vector<8x16x8xf32>,
    %c3 = arith.constant 3 : index
    %c0_20 = arith.constant 0 : index
    %c0_21 = arith.constant 0 : index
    %14 = vector.load %arg4[%c3, %c0_20, %c0_21] : memref<9x4x8xf32, #tpu.memory_space<vmem>>, vector<1x4x8xf32>
    %15 = vector.shape_cast %14 : vector<1x4x8xf32> to vector<4x8xf32>
    %16 = vector.extract_strided_slice %3 {offsets = [1, 0, 0], sizes = [7, 16, 4], strides = [1, 1, 1]} : vector<8x16x4xf32> to vector<7x16x4xf32>
    %17 = vector.shape_cast %16 : vector<7x16x4xf32> to vector<112x4xf32>
    %cst_22 = arith.constant dense<0.000000e+00> : vector<112x8xf32>
    %18 = tpu.matmul %17, %15, %cst_22 {dimension_numbers = #tpu.dot_dimension_numbers<[1], [0], [0], [1], [0, 0, 1, 1], [], []>} : vector<112x4xf32>, vector<4x8xf32>, vector<112x8xf32> -> vector<112x8xf32>
    %c0_23 = arith.constant 0 : index
    %c0_24 = arith.constant 0 : index
    %c0_25 = arith.constant 0 : index
    %19 = vector.load %arg7[%c0_23, %c0_24, %c0_25] : memref<8x16x8xf32, #tpu.memory_space<vmem>>, vector<7x16x8xf32>
    %20 = vector.shape_cast %18 : vector<112x8xf32> to vector<7x16x8xf32>
    %21 = arith.addf %19, %20 : vector<7x16x8xf32>
    %c0_26 = arith.constant 0 : index
    %c0_27 = arith.constant 0 : index
    %c0_28 = arith.constant 0 : index
    %22 = vector.load %arg7[%c0_26, %c0_27, %c0_28] : memref<8x16x8xf32, #tpu.memory_space<vmem>>, vector<7x16x8xf32>
    tpu.vector_store %arg7[%c0_26, %c0_27, %c0_28], %21 {strides = array<i32>} : memref<8x16x8xf32, #tpu.memory_space<vmem>>, vector<7x16x8xf32>,
    %23 = vector.extract_strided_slice %5 {offsets = [0, 0, 0], sizes = [1, 16, 4], strides = [1, 1, 1]} : vector<2x16x4xf32> to vector<1x16x4xf32>
    %24 = vector.shape_cast %23 : vector<1x16x4xf32> to vector<16x4xf32>
    %cst_29 = arith.constant dense<0.000000e+00> : vector<16x8xf32>
    %25 = tpu.matmul %24, %15, %cst_29 {dimension_numbers = #tpu.dot_dimension_numbers<[1], [0], [0], [1], [0, 0, 1, 1], [], []>} : vector<16x4xf32>, vector<4x8xf32>, vector<16x8xf32> -> vector<16x8xf32>
    %c7 = arith.constant 7 : index
    %c0_30 = arith.constant 0 : index
    %c0_31 = arith.constant 0 : index
    %26 = vector.load %arg7[%c7, %c0_30, %c0_31] : memref<8x16x8xf32, #tpu.memory_space<vmem>>, vector<1x16x8xf32>
    %27 = vector.shape_cast %25 : vector<16x8xf32> to vector<1x16x8xf32>
    %28 = arith.addf %26, %27 : vector<1x16x8xf32>
    %c7_32 = arith.constant 7 : index
    %c0_33 = arith.constant 0 : index
    %c0_34 = arith.constant 0 : index
    %29 = vector.load %arg7[%c7_32, %c0_33, %c0_34] : memref<8x16x8xf32, #tpu.memory_space<vmem>>, vector<1x16x8xf32>
    tpu.vector_store %arg7[%c7_32, %c0_33, %c0_34], %28 {strides = array<i32>} : memref<8x16x8xf32, #tpu.memory_space<vmem>>, vector<1x16x8xf32>,
    %c6 = arith.constant 6 : index
    %c0_35 = arith.constant 0 : index
    %c0_36 = arith.constant 0 : index
    %30 = vector.load %arg4[%c6, %c0_35, %c0_36] : memref<9x4x8xf32, #tpu.memory_space<vmem>>, vector<1x4x8xf32>
    %31 = vector.shape_cast %30 : vector<1x4x8xf32> to vector<4x8xf32>
    %32 = vector.extract_strided_slice %3 {offsets = [2, 0, 0], sizes = [6, 16, 4], strides = [1, 1, 1]} : vector<8x16x4xf32> to vector<6x16x4xf32>
    %33 = vector.shape_cast %32 : vector<6x16x4xf32> to vector<96x4xf32>
    %cst_37 = arith.constant dense<0.000000e+00> : vector<96x8xf32>
    %34 = tpu.matmul %33, %31, %cst_37 {dimension_numbers = #tpu.dot_dimension_numbers<[1], [0], [0], [1], [0, 0, 1, 1], [], []>} : vector<96x4xf32>, vector<4x8xf32>, vector<96x8xf32> -> vector<96x8xf32>
    %c0_38 = arith.constant 0 : index
    %c0_39 = arith.constant 0 : index
    %c0_40 = arith.constant 0 : index
    %35 = vector.load %arg7[%c0_38, %c0_39, %c0_40] : memref<8x16x8xf32, #tpu.memory_space<vmem>>, vector<6x16x8xf32>
    %36 = vector.shape_cast %34 : vector<96x8xf32> to vector<6x16x8xf32>
    %37 = arith.addf %35, %36 : vector<6x16x8xf32>
    %c0_41 = arith.constant 0 : index
    %c0_42 = arith.constant 0 : index
    %c0_43 = arith.constant 0 : index
    %38 = vector.load %arg7[%c0_41, %c0_42, %c0_43] : memref<8x16x8xf32, #tpu.memory_space<vmem>>, vector<6x16x8xf32>
    tpu.vector_store %arg7[%c0_41, %c0_42, %c0_43], %37 {strides = array<i32>} : memref<8x16x8xf32, #tpu.memory_space<vmem>>, vector<6x16x8xf32>,
    %39 = vector.shape_cast %5 : vector<2x16x4xf32> to vector<32x4xf32>
    %cst_44 = arith.constant dense<0.000000e+00> : vector<32x8xf32>
    %40 = tpu.matmul %39, %31, %cst_44 {dimension_numbers = #tpu.dot_dimension_numbers<[1], [0], [0], [1], [0, 0, 1, 1], [], []>} : vector<32x4xf32>, vector<4x8xf32>, vector<32x8xf32> -> vector<32x8xf32>
    %c6_45 = arith.constant 6 : index
    %c0_46 = arith.constant 0 : index
    %c0_47 = arith.constant 0 : index
    %41 = vector.load %arg7[%c6_45, %c0_46, %c0_47] : memref<8x16x8xf32, #tpu.memory_space<vmem>>, vector<2x16x8xf32>
    %42 = vector.shape_cast %40 : vector<32x8xf32> to vector<2x16x8xf32>
    %43 = arith.addf %41, %42 : vector<2x16x8xf32>
    %c6_48 = arith.constant 6 : index
    %c0_49 = arith.constant 0 : index
    %c0_50 = arith.constant 0 : index
    %44 = vector.load %arg7[%c6_48, %c0_49, %c0_50] : memref<8x16x8xf32, #tpu.memory_space<vmem>>, vector<2x16x8xf32>
    tpu.vector_store %arg7[%c6_48, %c0_49, %c0_50], %43 {strides = array<i32>} : memref<8x16x8xf32, #tpu.memory_space<vmem>>, vector<2x16x8xf32>,
    %c0_51 = arith.constant 0 : index
    %c0_52 = arith.constant 0 : index
    %c1 = arith.constant 1 : index
    %c0_53 = arith.constant 0 : index
    %45 = vector.load %arg2[%c0_51, %c0_52, %c1, %c0_53] : memref<1x8x18x4xf32, #tpu.memory_space<vmem>>, vector<1x8x16x4xf32>
    %46 = vector.shape_cast %45 : vector<1x8x16x4xf32> to vector<8x16x4xf32>
    %c0_54 = arith.constant 0 : index
    %c0_55 = arith.constant 0 : index
    %c1_56 = arith.constant 1 : index
    %c0_57 = arith.constant 0 : index
    %47 = vector.load %arg3[%c0_54, %c0_55, %c1_56, %c0_57] : memref<1x2x18x4xf32, #tpu.memory_space<vmem>>, vector<1x2x16x4xf32>
    %48 = vector.shape_cast %47 : vector<1x2x16x4xf32> to vector<2x16x4xf32>
    %c1_58 = arith.constant 1 : index
    %c0_59 = arith.constant 0 : index
    %c0_60 = arith.constant 0 : index
    %49 = vector.load %arg4[%c1_58, %c0_59, %c0_60] : memref<9x4x8xf32, #tpu.memory_space<vmem>>, vector<1x4x8xf32>
    %50 = vector.shape_cast %49 : vector<1x4x8xf32> to vector<4x8xf32>
    %51 = vector.shape_cast %46 : vector<8x16x4xf32> to vector<128x4xf32>
    %cst_61 = arith.constant dense<0.000000e+00> : vector<128x8xf32>
    %52 = tpu.matmul %51, %50, %cst_61 {dimension_numbers = #tpu.dot_dimension_numbers<[1], [0], [0], [1], [0, 0, 1, 1], [], []>} : vector<128x4xf32>, vector<4x8xf32>, vector<128x8xf32> -> vector<128x8xf32>
    %c0_62 = arith.constant 0 : index
    %c0_63 = arith.constant 0 : index
    %c0_64 = arith.constant 0 : index
    %53 = vector.load %arg7[%c0_62, %c0_63, %c0_64] : memref<8x16x8xf32, #tpu.memory_space<vmem>>, vector<8x16x8xf32>
    %54 = vector.shape_cast %52 : vector<128x8xf32> to vector<8x16x8xf32>
    %55 = arith.addf %53, %54 : vector<8x16x8xf32>
    %c0_65 = arith.constant 0 : index
    %c0_66 = arith.constant 0 : index
    %c0_67 = arith.constant 0 : index
    %56 = vector.load %arg7[%c0_65, %c0_66, %c0_67] : memref<8x16x8xf32, #tpu.memory_space<vmem>>, vector<8x16x8xf32>
    tpu.vector_store %arg7[%c0_65, %c0_66, %c0_67], %55 {strides = array<i32>} : memref<8x16x8xf32, #tpu.memory_space<vmem>>, vector<8x16x8xf32>,
    %c4 = arith.constant 4 : index
    %c0_68 = arith.constant 0 : index
    %c0_69 = arith.constant 0 : index
    %57 = vector.load %arg4[%c4, %c0_68, %c0_69] : memref<9x4x8xf32, #tpu.memory_space<vmem>>, vector<1x4x8xf32>
    %58 = vector.shape_cast %57 : vector<1x4x8xf32> to vector<4x8xf32>
    %59 = vector.extract_strided_slice %46 {offsets = [1, 0, 0], sizes = [7, 16, 4], strides = [1, 1, 1]} : vector<8x16x4xf32> to vector<7x16x4xf32>
    %60 = vector.shape_cast %59 : vector<7x16x4xf32> to vector<112x4xf32>
    %cst_70 = arith.constant dense<0.000000e+00> : vector<112x8xf32>
    %61 = tpu.matmul %60, %58, %cst_70 {dimension_numbers = #tpu.dot_dimension_numbers<[1], [0], [0], [1], [0, 0, 1, 1], [], []>} : vector<112x4xf32>, vector<4x8xf32>, vector<112x8xf32> -> vector<112x8xf32>
    %c0_71 = arith.constant 0 : index
    %c0_72 = arith.constant 0 : index
    %c0_73 = arith.constant 0 : index
    %62 = vector.load %arg7[%c0_71, %c0_72, %c0_73] : memref<8x16x8xf32, #tpu.memory_space<vmem>>, vector<7x16x8xf32>
    %63 = vector.shape_cast %61 : vector<112x8xf32> to vector<7x16x8xf32>
    %64 = arith.addf %62, %63 : vector<7x16x8xf32>
    %c0_74 = arith.constant 0 : index
    %c0_75 = arith.constant 0 : index
    %c0_76 = arith.constant 0 : index
    %65 = vector.load %arg7[%c0_74, %c0_75, %c0_76] : memref<8x16x8xf32, #tpu.memory_space<vmem>>, vector<7x16x8xf32>
    tpu.vector_store %arg7[%c0_74, %c0_75, %c0_76], %64 {strides = array<i32>} : memref<8x16x8xf32, #tpu.memory_space<vmem>>, vector<7x16x8xf32>,
    %66 = vector.extract_strided_slice %48 {offsets = [0, 0, 0], sizes = [1, 16, 4], strides = [1, 1, 1]} : vector<2x16x4xf32> to vector<1x16x4xf32>
    %67 = vector.shape_cast %66 : vector<1x16x4xf32> to vector<16x4xf32>
    %cst_77 = arith.constant dense<0.000000e+00> : vector<16x8xf32>
    %68 = tpu.matmul %67, %58, %cst_77 {dimension_numbers = #tpu.dot_dimension_numbers<[1], [0], [0], [1], [0, 0, 1, 1], [], []>} : vector<16x4xf32>, vector<4x8xf32>, vector<16x8xf32> -> vector<16x8xf32>
    %c7_78 = arith.constant 7 : index
    %c0_79 = arith.constant 0 : index
    %c0_80 = arith.constant 0 : index
    %69 = vector.load %arg7[%c7_78, %c0_79, %c0_80] : memref<8x16x8xf32, #tpu.memory_space<vmem>>, vector<1x16x8xf32>
    %70 = vector.shape_cast %68 : vector<16x8xf32> to vector<1x16x8xf32>
    %71 = arith.addf %69, %70 : vector<1x16x8xf32>
    %c7_81 = arith.constant 7 : index
    %c0_82 = arith.constant 0 : index
    %c0_83 = arith.constant 0 : index
    %72 = vector.load %arg7[%c7_81, %c0_82, %c0_83] : memref<8x16x8xf32, #tpu.memory_space<vmem>>, vector<1x16x8xf32>
    tpu.vector_store %arg7[%c7_81, %c0_82, %c0_83], %71 {strides = array<i32>} : memref<8x16x8xf32, #tpu.memory_space<vmem>>, vector<1x16x8xf32>,
    %c7_84 = arith.constant 7 : index
    %c0_85 = arith.constant 0 : index
    %c0_86 = arith.constant 0 : index
    %73 = vector.load %arg4[%c7_84, %c0_85, %c0_86] : memref<9x4x8xf32, #tpu.memory_space<vmem>>, vector<1x4x8xf32>
    %74 = vector.shape_cast %73 : vector<1x4x8xf32> to vector<4x8xf32>
    %75 = vector.extract_strided_slice %46 {offsets = [2, 0, 0], sizes = [6, 16, 4], strides = [1, 1, 1]} : vector<8x16x4xf32> to vector<6x16x4xf32>
    %76 = vector.shape_cast %75 : vector<6x16x4xf32> to vector<96x4xf32>
    %cst_87 = arith.constant dense<0.000000e+00> : vector<96x8xf32>
    %77 = tpu.matmul %76, %74, %cst_87 {dimension_numbers = #tpu.dot_dimension_numbers<[1], [0], [0], [1], [0, 0, 1, 1], [], []>} : vector<96x4xf32>, vector<4x8xf32>, vector<96x8xf32> -> vector<96x8xf32>
    %c0_88 = arith.constant 0 : index
    %c0_89 = arith.constant 0 : index
    %c0_90 = arith.constant 0 : index
    %78 = vector.load %arg7[%c0_88, %c0_89, %c0_90] : memref<8x16x8xf32, #tpu.memory_space<vmem>>, vector<6x16x8xf32>
    %79 = vector.shape_cast %77 : vector<96x8xf32> to vector<6x16x8xf32>
    %80 = arith.addf %78, %79 : vector<6x16x8xf32>
    %c0_91 = arith.constant 0 : index
    %c0_92 = arith.constant 0 : index
    %c0_93 = arith.constant 0 : index
    %81 = vector.load %arg7[%c0_91, %c0_92, %c0_93] : memref<8x16x8xf32, #tpu.memory_space<vmem>>, vector<6x16x8xf32>
    tpu.vector_store %arg7[%c0_91, %c0_92, %c0_93], %80 {strides = array<i32>} : memref<8x16x8xf32, #tpu.memory_space<vmem>>, vector<6x16x8xf32>,
    %82 = vector.shape_cast %48 : vector<2x16x4xf32> to vector<32x4xf32>
    %cst_94 = arith.constant dense<0.000000e+00> : vector<32x8xf32>
    %83 = tpu.matmul %82, %74, %cst_94 {dimension_numbers = #tpu.dot_dimension_numbers<[1], [0], [0], [1], [0, 0, 1, 1], [], []>} : vector<32x4xf32>, vector<4x8xf32>, vector<32x8xf32> -> vector<32x8xf32>
    %c6_95 = arith.constant 6 : index
    %c0_96 = arith.constant 0 : index
    %c0_97 = arith.constant 0 : index
    %84 = vector.load %arg7[%c6_95, %c0_96, %c0_97] : memref<8x16x8xf32, #tpu.memory_space<vmem>>, vector<2x16x8xf32>
    %85 = vector.shape_cast %83 : vector<32x8xf32> to vector<2x16x8xf32>
    %86 = arith.addf %84, %85 : vector<2x16x8xf32>
    %c6_98 = arith.constant 6 : index
    %c0_99 = arith.constant 0 : index
    %c0_100 = arith.constant 0 : index
    %87 = vector.load %arg7[%c6_98, %c0_99, %c0_100] : memref<8x16x8xf32, #tpu.memory_space<vmem>>, vector<2x16x8xf32>
    tpu.vector_store %arg7[%c6_98, %c0_99, %c0_100], %86 {strides = array<i32>} : memref<8x16x8xf32, #tpu.memory_space<vmem>>, vector<2x16x8xf32>,
    %c0_101 = arith.constant 0 : index
    %c0_102 = arith.constant 0 : index
    %c2 = arith.constant 2 : index
    %c0_103 = arith.constant 0 : index
    %88 = vector.load %arg2[%c0_101, %c0_102, %c2, %c0_103] : memref<1x8x18x4xf32, #tpu.memory_space<vmem>>, vector<1x8x16x4xf32>
    %89 = vector.shape_cast %88 : vector<1x8x16x4xf32> to vector<8x16x4xf32>
    %c0_104 = arith.constant 0 : index
    %c0_105 = arith.constant 0 : index
    %c2_106 = arith.constant 2 : index
    %c0_107 = arith.constant 0 : index
    %90 = vector.load %arg3[%c0_104, %c0_105, %c2_106, %c0_107] : memref<1x2x18x4xf32, #tpu.memory_space<vmem>>, vector<1x2x16x4xf32>
    %91 = vector.shape_cast %90 : vector<1x2x16x4xf32> to vector<2x16x4xf32>
    %c2_108 = arith.constant 2 : index
    %c0_109 = arith.constant 0 : index
    %c0_110 = arith.constant 0 : index
    %92 = vector.load %arg4[%c2_108, %c0_109, %c0_110] : memref<9x4x8xf32, #tpu.memory_space<vmem>>, vector<1x4x8xf32>
    %93 = vector.shape_cast %92 : vector<1x4x8xf32> to vector<4x8xf32>
    %94 = vector.shape_cast %89 : vector<8x16x4xf32> to vector<128x4xf32>
    %cst_111 = arith.constant dense<0.000000e+00> : vector<128x8xf32>
    %95 = tpu.matmul %94, %93, %cst_111 {dimension_numbers = #tpu.dot_dimension_numbers<[1], [0], [0], [1], [0, 0, 1, 1], [], []>} : vector<128x4xf32>, vector<4x8xf32>, vector<128x8xf32> -> vector<128x8xf32>
    %c0_112 = arith.constant 0 : index
    %c0_113 = arith.constant 0 : index
    %c0_114 = arith.constant 0 : index
    %96 = vector.load %arg7[%c0_112, %c0_113, %c0_114] : memref<8x16x8xf32, #tpu.memory_space<vmem>>, vector<8x16x8xf32>
    %97 = vector.shape_cast %95 : vector<128x8xf32> to vector<8x16x8xf32>
    %98 = arith.addf %96, %97 : vector<8x16x8xf32>
    %c0_115 = arith.constant 0 : index
    %c0_116 = arith.constant 0 : index
    %c0_117 = arith.constant 0 : index
    %99 = vector.load %arg7[%c0_115, %c0_116, %c0_117] : memref<8x16x8xf32, #tpu.memory_space<vmem>>, vector<8x16x8xf32>
    tpu.vector_store %arg7[%c0_115, %c0_116, %c0_117], %98 {strides = array<i32>} : memref<8x16x8xf32, #tpu.memory_space<vmem>>, vector<8x16x8xf32>,
    %c5 = arith.constant 5 : index
    %c0_118 = arith.constant 0 : index
    %c0_119 = arith.constant 0 : index
    %100 = vector.load %arg4[%c5, %c0_118, %c0_119] : memref<9x4x8xf32, #tpu.memory_space<vmem>>, vector<1x4x8xf32>
    %101 = vector.shape_cast %100 : vector<1x4x8xf32> to vector<4x8xf32>
    %102 = vector.extract_strided_slice %89 {offsets = [1, 0, 0], sizes = [7, 16, 4], strides = [1, 1, 1]} : vector<8x16x4xf32> to vector<7x16x4xf32>
    %103 = vector.shape_cast %102 : vector<7x16x4xf32> to vector<112x4xf32>
    %cst_120 = arith.constant dense<0.000000e+00> : vector<112x8xf32>
    %104 = tpu.matmul %103, %101, %cst_120 {dimension_numbers = #tpu.dot_dimension_numbers<[1], [0], [0], [1], [0, 0, 1, 1], [], []>} : vector<112x4xf32>, vector<4x8xf32>, vector<112x8xf32> -> vector<112x8xf32>
    %c0_121 = arith.constant 0 : index
    %c0_122 = arith.constant 0 : index
    %c0_123 = arith.constant 0 : index
    %105 = vector.load %arg7[%c0_121, %c0_122, %c0_123] : memref<8x16x8xf32, #tpu.memory_space<vmem>>, vector<7x16x8xf32>
    %106 = vector.shape_cast %104 : vector<112x8xf32> to vector<7x16x8xf32>
    %107 = arith.addf %105, %106 : vector<7x16x8xf32>
    %c0_124 = arith.constant 0 : index
    %c0_125 = arith.constant 0 : index
    %c0_126 = arith.constant 0 : index
    %108 = vector.load %arg7[%c0_124, %c0_125, %c0_126] : memref<8x16x8xf32, #tpu.memory_space<vmem>>, vector<7x16x8xf32>
    tpu.vector_store %arg7[%c0_124, %c0_125, %c0_126], %107 {strides = array<i32>} : memref<8x16x8xf32, #tpu.memory_space<vmem>>, vector<7x16x8xf32>,
    %109 = vector.extract_strided_slice %91 {offsets = [0, 0, 0], sizes = [1, 16, 4], strides = [1, 1, 1]} : vector<2x16x4xf32> to vector<1x16x4xf32>
    %110 = vector.shape_cast %109 : vector<1x16x4xf32> to vector<16x4xf32>
    %cst_127 = arith.constant dense<0.000000e+00> : vector<16x8xf32>
    %111 = tpu.matmul %110, %101, %cst_127 {dimension_numbers = #tpu.dot_dimension_numbers<[1], [0], [0], [1], [0, 0, 1, 1], [], []>} : vector<16x4xf32>, vector<4x8xf32>, vector<16x8xf32> -> vector<16x8xf32>
    %c7_128 = arith.constant 7 : index
    %c0_129 = arith.constant 0 : index
    %c0_130 = arith.constant 0 : index
    %112 = vector.load %arg7[%c7_128, %c0_129, %c0_130] : memref<8x16x8xf32, #tpu.memory_space<vmem>>, vector<1x16x8xf32>
    %113 = vector.shape_cast %111 : vector<16x8xf32> to vector<1x16x8xf32>
    %114 = arith.addf %112, %113 : vector<1x16x8xf32>
    %c7_131 = arith.constant 7 : index
    %c0_132 = arith.constant 0 : index
    %c0_133 = arith.constant 0 : index
    %115 = vector.load %arg7[%c7_131, %c0_132, %c0_133] : memref<8x16x8xf32, #tpu.memory_space<vmem>>, vector<1x16x8xf32>
    tpu.vector_store %arg7[%c7_131, %c0_132, %c0_133], %114 {strides = array<i32>} : memref<8x16x8xf32, #tpu.memory_space<vmem>>, vector<1x16x8xf32>,
    %c8 = arith.constant 8 : index
    %c0_134 = arith.constant 0 : index
    %c0_135 = arith.constant 0 : index
    %116 = vector.load %arg4[%c8, %c0_134, %c0_135] : memref<9x4x8xf32, #tpu.memory_space<vmem>>, vector<1x4x8xf32>
    %117 = vector.shape_cast %116 : vector<1x4x8xf32> to vector<4x8xf32>
    %118 = vector.extract_strided_slice %89 {offsets = [2, 0, 0], sizes = [6, 16, 4], strides = [1, 1, 1]} : vector<8x16x4xf32> to vector<6x16x4xf32>
    %119 = vector.shape_cast %118 : vector<6x16x4xf32> to vector<96x4xf32>
    %cst_136 = arith.constant dense<0.000000e+00> : vector<96x8xf32>
    %120 = tpu.matmul %119, %117, %cst_136 {dimension_numbers = #tpu.dot_dimension_numbers<[1], [0], [0], [1], [0, 0, 1, 1], [], []>} : vector<96x4xf32>, vector<4x8xf32>, vector<96x8xf32> -> vector<96x8xf32>
    %c0_137 = arith.constant 0 : index
    %c0_138 = arith.constant 0 : index
    %c0_139 = arith.constant 0 : index
    %121 = vector.load %arg7[%c0_137, %c0_138, %c0_139] : memref<8x16x8xf32, #tpu.memory_space<vmem>>, vector<6x16x8xf32>
    %122 = vector.shape_cast %120 : vector<96x8xf32> to vector<6x16x8xf32>
    %123 = arith.addf %121, %122 : vector<6x16x8xf32>
    %c0_140 = arith.constant 0 : index
    %c0_141 = arith.constant 0 : index
    %c0_142 = arith.constant 0 : index
    %124 = vector.load %arg7[%c0_140, %c0_141, %c0_142] : memref<8x16x8xf32, #tpu.memory_space<vmem>>, vector<6x16x8xf32>
    tpu.vector_store %arg7[%c0_140, %c0_141, %c0_142], %123 {strides = array<i32>} : memref<8x16x8xf32, #tpu.memory_space<vmem>>, vector<6x16x8xf32>,
    %125 = vector.shape_cast %91 : vector<2x16x4xf32> to vector<32x4xf32>
    %cst_143 = arith.constant dense<0.000000e+00> : vector<32x8xf32>
    %126 = tpu.matmul %125, %117, %cst_143 {dimension_numbers = #tpu.dot_dimension_numbers<[1], [0], [0], [1], [0, 0, 1, 1], [], []>} : vector<32x4xf32>, vector<4x8xf32>, vector<32x8xf32> -> vector<32x8xf32>
    %c6_144 = arith.constant 6 : index
    %c0_145 = arith.constant 0 : index
    %c0_146 = arith.constant 0 : index
    %127 = vector.load %arg7[%c6_144, %c0_145, %c0_146] : memref<8x16x8xf32, #tpu.memory_space<vmem>>, vector<2x16x8xf32>
    %128 = vector.shape_cast %126 : vector<32x8xf32> to vector<2x16x8xf32>
    %129 = arith.addf %127, %128 : vector<2x16x8xf32>
    %c6_147 = arith.constant 6 : index
    %c0_148 = arith.constant 0 : index
    %c0_149 = arith.constant 0 : index
    %130 = vector.load %arg7[%c6_147, %c0_148, %c0_149] : memref<8x16x8xf32, #tpu.memory_space<vmem>>, vector<2x16x8xf32>
    tpu.vector_store %arg7[%c6_147, %c0_148, %c0_149], %129 {strides = array<i32>} : memref<8x16x8xf32, #tpu.memory_space<vmem>>, vector<2x16x8xf32>,
    %c0_150 = arith.constant 0 : index
    %c0_151 = arith.constant 0 : index
    %c0_152 = arith.constant 0 : index
    %131 = vector.load %arg7[%c0_150, %c0_151, %c0_152] : memref<8x16x8xf32, #tpu.memory_space<vmem>>, vector<8x16x8xf32>
    %c0_153 = arith.constant 0 : index
    %c0_154 = arith.constant 0 : index
    %132 = vector.load %arg5[%c0_153, %c0_154] : memref<1x8xf32, #tpu.memory_space<vmem>>, vector<1x8xf32>
    %133 = vector.shape_cast %132 : vector<1x8xf32> to vector<8xf32>
    %134 = vector.shape_cast %133 : vector<8xf32> to vector<1x1x8xf32>
    %135 = vector.broadcast %134 : vector<1x1x8xf32> to vector<8x16x8xf32>
    %136 = arith.addf %131, %135 : vector<8x16x8xf32>
    %137 = vector.shape_cast %136 : vector<8x16x8xf32> to vector<1x8x128xf32>
    %c0_155 = arith.constant 0 : index
    %c0_156 = arith.constant 0 : index
    %c0_157 = arith.constant 0 : index
    %138 = vector.load %arg6[%c0_155, %c0_156, %c0_157] : memref<1x8x128xf32, #tpu.memory_space<vmem>>, vector<1x8x128xf32>
    tpu.vector_store %arg6[%c0_155, %c0_156, %c0_157], %137 {strides = array<i32>} : memref<1x8x128xf32, #tpu.memory_space<vmem>>, vector<1x8x128xf32>,
    return
  }
  func.func @transform_0(%arg0: i32, %arg1: i32) -> (i32, i32, i32, i32) {
    %c0_i32 = arith.constant 0 : i32
    %c0_i32_0 = arith.constant 0 : i32
    %c0_i32_1 = arith.constant 0 : i32
    return %arg0, %arg1, %c0_i32, %c0_i32_0 : i32, i32, i32, i32
  }
  func.func @transform_1(%arg0: i32, %arg1: i32) -> (i32, i32, i32, i32) {
    %c1_i32 = arith.constant 1 : i32
    %0 = arith.addi %arg1, %c1_i32 : i32
    %c4_i32 = arith.constant 4 : i32
    %1 = arith.muli %0, %c4_i32 : i32
    %c0_i32 = arith.constant 0 : i32
    %c0_i32_0 = arith.constant 0 : i32
    %c0_i32_1 = arith.constant 0 : i32
    return %arg0, %1, %c0_i32, %c0_i32_0 : i32, i32, i32, i32
  }
  func.func @transform_2(%arg0: i32, %arg1: i32) -> (i32, i32, i32) {
    %c0_i32 = arith.constant 0 : i32
    %c0_i32_0 = arith.constant 0 : i32
    %c0_i32_1 = arith.constant 0 : i32
    %c0_i32_2 = arith.constant 0 : i32
    return %c0_i32, %c0_i32_0, %c0_i32_1 : i32, i32, i32
  }
  func.func @transform_3(%arg0: i32, %arg1: i32) -> (i32, i32) {
    %c0_i32 = arith.constant 0 : i32
    %c0_i32_0 = arith.constant 0 : i32
    %c0_i32_1 = arith.constant 0 : i32
    return %c0_i32, %c0_i32_0 : i32, i32
  }
  func.func @transform_4(%arg0: i32, %arg1: i32) -> (i32, i32, i32) {
    %c0_i32 = arith.constant 0 : i32
    %c0_i32_0 = arith.constant 0 : i32
    return %arg0, %arg1, %c0_i32 : i32, i32, i32
  }
}

</mosaic_0001>

<bundles_post_ra>
// kernel: tpu_custom_call.1
= control target key start
LH: loop header
LB: loop body
LE: loop exit
PB: predicated region body
PF: predicated region fallthrough
CT: control target
= control target key end

     0   :  { %9 = vsyncpa [#allocation4], 0  ;;  %s4795_s0 = inlined_call_operand.vmem [shape: f32[2,18,18,4], index: 0, kind: input, shape index: {}]   ;;  %s4796_s1 = inlined_call_operand.vmem [shape: f32[2,18,18,4], index: 1, kind: input, shape index: {}]   ;;  %s4797_s2 = inlined_call_operand.vmem [shape: f32[9,4,8], index: 2, kind: input, shape index: {}]   ;;  %s4798_s3 = inlined_call_operand.vmem [shape: f32[1,8], index: 3, kind: input, shape index: {}]   ;;  %s4799_s4 = inlined_call_operand.hbm [shape: f32[2,16,128], index: 4, kind: output, shape index: {}]  }
   0x1   :  { %11 = vsyncpa [#allocation4 + $0x1], 0  ;;  %s4090_s15 = smov 0   ;;  %s4092_s16 = smov 0  }
   0x2   :  { %s4094_s17 = smov 0   ;;  %s4096_s18 = smov 0  }
   0x3   :  { %s4098_s19 = smov 0   ;;  %s4100_s20 = smov 0  }
   0x4   :  { %s4102_s21 = smov 0   ;;  %s4104_s22 = smov 0  }
   0x5 LB: > { %s3258_s23 = sadd.s32 4294967295, %s4044_s22   ;;  %s3259_s24 = sadd.s32 4294967294, %s4044_s22   ;;  %s4044_s22 = sphi %s4104_s22, %s17_s22   ;;  %s4040_s21 = sphi %s4102_s21, %s4808_s21   ;;  %s4036_s20 = sphi %s4100_s20, %s4807_s20   ;;  %s4032_s19 = sphi %s4098_s19, %s4806_s19   ;;  %s4028_s18 = sphi %s4096_s18, %s4805_s18   ;;  %s4024_s17 = sphi %s4094_s17, %s4804_s17   ;;  %s4020_s16 = sphi %s4092_s16, %s4803_s16   ;;  %s4016_s15 = sphi %s4090_s15, %s4802_s15  }
   0x6   : > { %s26_s25 = sadd.s32 1, %s4036_s20  ;;  %s29_s26 = sadd.s32 1, %s4040_s21 }
   0x7   : > { %p27_p0 = scmp.ge.s32.totalorder %s26_s25, 2  ;;  %p150_p1 = scmp.ne.s32.totalorder %s4024_s17, %s4020_s16 }
   0x8   : > { %p151_p2 = scmp.eq.s32.totalorder %s3258_s23, 3  ;;  %p156_p5 = scmp.ne.s32.totalorder %s4020_s16, %s4016_s15 }
   0x9   : > { %s4810_s25 = smov (%p27_p0, %s26_s25), 0  ;;  %s4812_s26 = smov (!%p27_p0, %s29_s26), %s4040_s21 }
   0xa   : > { %s136_s27 = ssub.s32 %s4036_s20, %s4810_s25  ;;  %p4141_p3 = por %p151_p2, %p150_p1 }
   0xb   : > { %p31_p4 = scmp.ge.s32.totalorder %s4812_s26, 2  ;;  %p157_p6 = scmp.eq.s32.totalorder %s3259_s24, 3 }
   0xc   : > { %p3264_p7 = scmp.ge.s32.totalorder %s4044_s22, 1  ;;  %p223_p9 = scmp.lt.s32.totalorder %s4044_s22, 5 }
   0xd   : > { %s4814_s26 = smov (%p31_p4, %s4812_s26), 0  ;;  %p4150_p8 = por %p157_p6, %p156_p5 }
   0xe   : > { %s135_s30 = ssub.s32 %s4040_s21, %s4814_s26  ;;  %s140_s5 = sadd.s32 1, %s4024_s17 }
   0xf   : > { %s137_s6 = sor.u32 %s136_s27, %s135_s30  ;;  %p224_p10 = pnand %p3264_p7, %p223_p9 }
  0x10   : > { %p138_p11 = scmp.eq.s32.totalorder %s137_s6, 0  ;;  %s4165_s10 = sshll.u32 (!%p224_p10), %s4028_s18, 3 }
  0x11   : > { %227 = sbr.rel (%p224_p10) target bundleno = 546 (0x222), region = 36  ;;  %p277_p12 = scmp.lt.s32.totalorder (!%p224_p10), %s4032_s19, 1 }
  0x12   : > { %s4159_s7 = scalar_select %p138_p11, %s4024_s17, %s140_s5  }
  0x13   : > { %p279_p13 = scmp.lt.s32.totalorder (!%p224_p10), %s4165_s10, 17  ;;  %s3452_s14 = sadd.s32 (!%p224_p10), 8, %s4165_s10 }
  0x14   : > { %p297_p0 = scmp.lt.s32.totalorder (!%p224_p10), %s3452_s14, 17  ;;  %s4052_s9 = smov (!%p224_p10), 80  }
  0x15   : > { %s4053_s12 = smov (!%p224_p10), 24   ;;  %s4054_s13 = smov (!%p224_p10), 8  }
  0x16   : > { %v344_v0 = vld [vmem:[%s4797_s2] sm:$0xf]  ;;  %vm394_vm0 = vcmask 1043456   ;;  %v3288_v1 = vld [vmem:[%s4797_s2 + $0xc] sm:$0xf]  ;;  %s4182_s23 = scalar_select %p277_p12, %s4032_s19, 1 }
  0x17   : > { %3858 = vmatprep.subr.msk.mxu1 %vm394_vm0, %v344_v0  ;;  %3612 = vmatprep.subr.msk.mxu0 %vm394_vm0, %v344_v0  ;;  %v4177_v2 = vld [vmem:[%s4797_s2 + $0x18] sm:$0xf]  ;;  %s280_s24 = scalar_select %p279_p13, %s4165_s10, 17  ;;  %vm345_vm1 = vcmask 31744   ;;  %v4217_v9 = vld [vmem:[%s4797_s2 + $0x10] sm:$0xf] }
  0x18   : > { %3859 = vmatpush3.msk.msra.mxu1 %vm394_vm0, %v344_v0  ;;  %3613 = vmatpush3.msk.msra.mxu0 %vm394_vm0, %v344_v0  ;;  %s3861_s27 = smul.u32 54, %s4182_s23  ;;  %vm307_vm2 = vcmask 64512   ;;  %s4816_s14 = smov (!%p297_p0, %s3452_s14), 17  ;;  %v4046_v18 = vmov 0.0   ;;  %v4289_v21 = vld [vmem:[%s4797_s2 + $0x1c] sm:$0xf] }
  0x19   : > { %3638 = vmatprep.subr.msk.mxu1 %vm394_vm0, %v3288_v1  ;;  %3666 = vmatprep.subr.msk.mxu0 %vm394_vm0, %v4177_v2  ;;  %s3860_s30 = smul.u32 3, %s280_s24  ;;  %309 = vst.msk [vmem:[#allocation2 + $0x8] sm:$0xff] %vm307_vm2, %v4046_v18  ;;  %308 = vst.msk [vmem:[#allocation2] sm:$0xff] %vm307_vm2, %v4046_v18  ;;  %v3326_v24 = vld [vmem:[%s4797_s2 + $0x4] sm:$0xf]  ;;  %s4049_s23 = smov 72  }
  0x1a   : > { %310 = vst.msk [vmem:[#allocation2 + $0x10] sm:$0xff] %vm307_vm2, %v4046_v18  ;;  %311 = vst.msk [vmem:[#allocation2 + $0x18] sm:$0xff] %vm307_vm2, %v4046_v18  ;;  %s3862_s10 = smul.u32 3, %s4816_s14  ;;  %v3382_v32 = vld [vmem:[%s4797_s2 + $0x8] sm:$0xf]  ;;  %s4055_s14 = smov 32  }
  0x1b   : > { %s283_s5 = sadd.s32 %s3861_s27, %s3860_s30  ;;  %312 = vst.msk [vmem:[#allocation2 + $0x20] sm:$0xff] %vm307_vm2, %v4046_v18  ;;  %313 = vst.msk [vmem:[#allocation2 + $0x28] sm:$0xff] %vm307_vm2, %v4046_v18  ;;  %v3400_v48 = vld [vmem:[%s4797_s2 + $0x14] sm:$0xf]  ;;  %v3419_v52 = vld [vmem:[%s4797_s2 + $0x20] sm:$0xf] }
  0x1c   : > { %s3267_s6 = sshll.u32 %s283_s5, 3  ;;  %314 = vst.msk [vmem:[#allocation2 + $0x30] sm:$0xff] %vm307_vm2, %v4046_v18  ;;  %315 = vst.msk [vmem:[#allocation2 + $0x38] sm:$0xff] %vm307_vm2, %v4046_v18  ;;  %s301_s24 = sadd.s32 %s3862_s10, %s3861_s27  ;;  %vm3111_vm3 = vcmask 130048   ;;  %vm3113_vm4 = vcmask 195584   ;;  %vm3115_vm5 = vcmask 261120  }
  0x1d   : > { %s4194_s11 = scalar_lea.vmem %s4795_s0, %s3267_s6  ;;  %316 = vst.msk [vmem:[#allocation2 + $0x40] sm:$0xff] %vm307_vm2, %v4046_v18  ;;  %317 = vst.msk [vmem:[#allocation2 + $0x48] sm:$0xff] %vm307_vm2, %v4046_v18  ;;  %s3270_s6 = sshll.u32 %s301_s24, 3  ;;  %vm3117_vm6 = vcmask 326656   ;;  %vm3119_vm7 = vcmask 392192   ;;  %vm3121_vm8 = vcmask 457728  }
  0x1e   : > { %v324_v3 = vld [vmem:[%s4194_s11] sm:$0xff]  ;;  %v4198_v4 = vld [vmem:[%s4194_s11 + $0x90] sm:$0xff]  ;;  %v325_v5 = vld [vmem:[%s4194_s11 + $0x8] sm:$0xff]  ;;  %318 = vst.msk [vmem:[#allocation2 + $0x50] sm:$0xff] %vm307_vm2, %v4046_v18  ;;  %s4303_s8 = scalar_lea.vmem %s4796_s1, %s3270_s6  ;;  %s4050_s27 = smov 64   ;;  %vm3123_vm9 = vcmask 523264  }
  0x1f   : > { %3614 = vmatprep.mubr.msk.f32.mxu0 %vm345_vm1, %v324_v3  ;;  %3632 = vmatprep.mubr.msk.f32.mxu1 %vm345_vm1, %v4198_v4  ;;  %v4205_v6 = vld [vmem:[%s4194_s11 + $0x98] sm:$0xff]  ;;  %v4209_v8 = vld [vmem:[%s4194_s11 + $0xa8] sm:$0xff]  ;;  %v327_v10 = vld [vmem:[%s4194_s11 + $0x20] sm:$0xff]  ;;  %319 = vst.msk [vmem:[#allocation2 + $0x58] sm:$0xff] %vm307_vm2, %v4046_v18  ;;  %s4056_s10 = smov 16   ;;  %s4057_s24 = smov 48  }
  0x20   : > { %v326_v7 = vld [vmem:[%s4194_s11 + $0x18] sm:$0xff]  ;;  %3615 = vmatmul.mubr.msk.f32.vlgmr.msra.gmra.mxu0 %vm345_vm1, %v325_v5  ;;  %3633 = vmatmul.mubr.msk.f32.vlgmr.msra.gmra.mxu1 %vm345_vm1, %v4205_v6  ;;  %v4224_v11 = vld [vmem:[%s4194_s11 + $0xb0] sm:$0xff]  ;;  %v330_v14 = vld [vmem:[%s4194_s11 + $0x48] sm:$0xff]  ;;  %320 = vst.msk [vmem:[#allocation2 + $0x60] sm:$0xff] %vm307_vm2, %v4046_v18  ;;  %s4058_s30 = smov 40   ;;  %s4059_s5 = smov 96  }
  0x21   : > { %3639 = vmatpush3.msk.msra.mxu1 %vm394_vm0, %v3288_v1  ;;  %3667 = vmatpush3.msk.msra.mxu0 %vm394_vm0, %v4177_v2  ;;  %v328_v12 = vld [vmem:[%s4194_s11 + $0x30] sm:$0xff]  ;;  %v329_v13 = vld [vmem:[%s4194_s11 + $0x38] sm:$0xff]  ;;  %v332_v16 = vld [vmem:[%s4194_s11 + $0x60] sm:$0xff]  ;;  %321 = vst.msk [vmem:[#allocation2 + $0x68] sm:$0xff] %vm307_vm2, %v4046_v18  ;;  %s4061_s6 = smov 112   ;;  %vm3125_vm10 = vcmask 588800  }
  0x22   : > { %3617 = vmatprep.mubr.msk.f32.mxu0 %vm345_vm1, %v326_v7  ;;  %3635 = vmatprep.mubr.msk.f32.mxu1 %vm345_vm1, %v4209_v8  ;;  %v331_v15 = vld [vmem:[%s4194_s11 + $0x50] sm:$0xff]  ;;  %v333_v17 = vld [vmem:[%s4194_s11 + $0x68] sm:$0xff]  ;;  %322 = vst.msk [vmem:[#allocation2 + $0x70] sm:$0xff] %vm307_vm2, %v4046_v18  ;;  %323 = vst.msk [vmem:[#allocation2 + $0x78] sm:$0xff] %vm307_vm2, %v4046_v18  ;;  %vm3127_vm11 = vcmask 654336   ;;  %vm3129_vm12 = vcmask 719872  }
  0x23   : > { %3661 = vmatprep.subr.msk.mxu1 %vm394_vm0, %v3288_v1  ;;  %3720 = vmatprep.subr.msk.mxu0 %vm394_vm0, %v4217_v9  ;;  %v334_v19 = vld [vmem:[%s4194_s11 + $0x78] sm:$0xff]  ;;  %v335_v20 = vld [vmem:[%s4194_s11 + $0x80] sm:$0xff]  ;;  %v341_v23 = vld [vmem:[%s4303_s8 + $0x8] sm:$0xff]  ;;  %vm3131_vm13 = vcmask 785408   ;;  %vm3133_vm14 = vcmask 850944   ;;  %vm3135_vm15 = vcmask 916480  }
  0x24   : > { %3618 = vmatmul.mubr.msk.f32.gmra.mxu0 %vm345_vm1, %v327_v10  ;;  %3636 = vmatmul.mubr.msk.f32.gmra.mxu1 %vm345_vm1, %v4224_v11  ;;  %v340_v22 = vld [vmem:[%s4303_s8] sm:$0xff]  ;;  %v342_v25 = vld [vmem:[%s4303_s8 + $0x18] sm:$0xff]  ;;  %v1132_v29 = vld [vmem:[%s4194_s11 + $0x9] sm:$0xff] }
  0x25   : > { %3620 = vmatprep.mubr.msk.f32.mxu0 %vm345_vm1, %v328_v12  ;;  %3640 = vmatprep.mubr.msk.f32.mxu1 %vm345_vm1, %v326_v7  ;;  %v343_v26 = vld [vmem:[%s4303_s8 + $0x20] sm:$0xff]  ;;  %v1135_v31 = vld [vmem:[%s4194_s11 + $0x31] sm:$0xff]  ;;  %v1137_v34 = vld [vmem:[%s4194_s11 + $0x49] sm:$0xff] }
  0x26   : > { %v1131_v27 = vld [vmem:[%s4194_s11 + $0x1] sm:$0xff]  ;;  %v1133_v28 = vld [vmem:[%s4194_s11 + $0x19] sm:$0xff]  ;;  %v1138_v35 = vld [vmem:[%s4194_s11 + $0x51] sm:$0xff] }
  0x27   : > { %v1134_v30 = vld [vmem:[%s4194_s11 + $0x21] sm:$0xff]  ;;  %v1136_v33 = vld [vmem:[%s4194_s11 + $0x39] sm:$0xff]  ;;  %v1140_v37 = vld [vmem:[%s4194_s11 + $0x69] sm:$0xff] }
  0x28   : > { %3621 = vmatmul.mubr.msk.f32.gmra.mxu0 %vm345_vm1, %v329_v13  ;;  %3641 = vmatmul.mubr.msk.f32.vlgmr.msra.gmra.mxu1 %vm345_vm1, %v327_v10  ;;  %v1139_v36 = vld [vmem:[%s4194_s11 + $0x61] sm:$0xff]  ;;  %v1141_v38 = vld [vmem:[%s4194_s11 + $0x79] sm:$0xff]  ;;  %v1143_v40 = vld [vmem:[%s4194_s11 + $0x91] sm:$0xff] }
  0x29   : > { %3662 = vmatpush3.msk.msra.mxu1 %vm394_vm0, %v3288_v1  ;;  %3623 = vmatprep.mubr.msk.f32.mxu0 %vm345_vm1, %v330_v14  ;;  %v1142_v39 = vld [vmem:[%s4194_s11 + $0x81] sm:$0xff]  ;;  %v1144_v41 = vld [vmem:[%s4194_s11 + $0x99] sm:$0xff]  ;;  %v1145_v42 = vld [vmem:[%s4194_s11 + $0xa9] sm:$0xff] }
  0x2a   : > { %3643 = vmatprep.mubr.msk.f32.mxu1 %vm345_vm1, %v328_v12  ;;  %3686 = vmatprep.subr.msk.mxu1 %vm394_vm0, %v4177_v2  ;;  %v1146_v43 = vld [vmem:[%s4194_s11 + $0xb1] sm:$0xff]  ;;  %v1147_v44 = vld [vmem:[%s4303_s8 + $0x1] sm:$0xff]  ;;  %v1148_v45 = vld [vmem:[%s4303_s8 + $0x9] sm:$0xff] }
  0x2b   : > { %v1149_v46 = vld [vmem:[%s4303_s8 + $0x19] sm:$0xff]  ;;  %v1150_v47 = vld [vmem:[%s4303_s8 + $0x21] sm:$0xff]  ;;  %v1936_v50 = vld [vmem:[%s4194_s11 + $0xa] sm:$0xff] }
  0x2c   : > { %3624 = vmatmul.mubr.msk.f32.gmra.mxu0 %vm345_vm1, %v331_v15  ;;  %3644 = vmatmul.mubr.msk.f32.gmra.mxu1 %vm345_vm1, %v329_v13  ;;  %v1935_v49 = vld [vmem:[%s4194_s11 + $0x2] sm:$0xff]  ;;  %v1937_v51 = vld [vmem:[%s4194_s11 + $0x1a] sm:$0xff]  ;;  %v1939_v54 = vld [vmem:[%s4194_s11 + $0x32] sm:$0xff] }
  0x2d   : > { %3626 = vmatprep.mubr.msk.f32.mxu0 %vm345_vm1, %v332_v16  ;;  %3646 = vmatprep.mubr.msk.f32.mxu1 %vm345_vm1, %v330_v14  ;;  %v1938_v53 = vld [vmem:[%s4194_s11 + $0x22] sm:$0xff]  ;;  %v1940_v55 = vld [vmem:[%s4194_s11 + $0x3a] sm:$0xff]  ;;  %v1941_v56 = vld [vmem:[%s4194_s11 + $0x4a] sm:$0xff] }
  0x2e   : > { %v1942_v57 = vld [vmem:[%s4194_s11 + $0x52] sm:$0xff]  ;;  %v1943_v58 = vld [vmem:[%s4194_s11 + $0x62] sm:$0xff]  ;;  %v1944_v59 = vld [vmem:[%s4194_s11 + $0x6a] sm:$0xff] }
  0x2f   : > { %v1945_v60 = vld [vmem:[%s4194_s11 + $0x7a] sm:$0xff]  ;;  %v1946_v61 = vld [vmem:[%s4194_s11 + $0x82] sm:$0xff]  ;;  %v1947_v62 = vld [vmem:[%s4194_s11 + $0x92] sm:$0xff] }
  0x30   : > { %3627 = vmatmul.mubr.msk.f32.gmra.mxu0 %vm345_vm1, %v333_v17  ;;  %3647 = vmatmul.mubr.msk.f32.gmra.mxu1 %vm345_vm1, %v331_v15  ;;  %v1948_v63 = vld [vmem:[%s4194_s11 + $0x9a] sm:$0xff]  ;;  %v1949_v0 = vld [vmem:[%s4194_s11 + $0xaa] sm:$0xff]  ;;  %v1950_v1 = vld [vmem:[%s4194_s11 + $0xb2] sm:$0xff]  ;;  %s4060_s11 = smov 56  }
  0x31   : > { %3629 = vmatprep.mubr.msk.f32.mxu0 %vm345_vm1, %v334_v19  ;;  %3649 = vmatprep.mubr.msk.f32.mxu1 %vm345_vm1, %v332_v16  ;;  %v1952_v3 = vld [vmem:[%s4303_s8 + $0xa] sm:$0xff]  ;;  %v1954_v5 = vld [vmem:[%s4303_s8 + $0x22] sm:$0xff] }
  0x32   : > { %v556_v7 = vld [vmem:[#allocation2 + $0x68] sm:$0xff]  ;;  %v543_v10 = vld [vmem:[#allocation2] sm:$0xff] }
  0x34   : > { %3630 = vmatmul.mubr.msk.f32.gmra.mxu0 %vm345_vm1, %v335_v20  ;;  %3650 = vmatmul.mubr.msk.f32.gmra.mxu1 %vm345_vm1, %v333_v17 }
  0x35   : > { %3652 = vmatprep.mubr.msk.f32.mxu1 %vm345_vm1, %v334_v19  ;;  %3668 = vmatprep.mubr.msk.f32.mxu0 %vm345_vm1, %v328_v12 }
  0x38   : > { %3653 = vmatmul.mubr.msk.f32.gmra.mxu1 %vm345_vm1, %v335_v20  ;;  %3669 = vmatmul.mubr.msk.f32.vlgmr.msra.gmra.mxu0 %vm345_vm1, %v329_v13 }
  0x39   : > { %3721 = vmatpush3.msk.msra.mxu0 %vm394_vm0, %v4217_v9  ;;  %3655 = vmatprep.mubr.msk.f32.mxu1 %vm345_vm1, %v4198_v4 }
  0x3a   : > { %3671 = vmatprep.mubr.msk.f32.mxu0 %vm345_vm1, %v330_v14  ;;  %3768 = vmatprep.subr.msk.mxu0 %vm394_vm0, %v4289_v21 }
  0x3c   : > { %3656 = vmatmul.mubr.msk.f32.gmra.mxu1 %vm345_vm1, %v4205_v6  ;;  %3672 = vmatmul.mubr.msk.f32.gmra.mxu0 %vm345_vm1, %v331_v15 }
  0x3d   : > { %3658 = vmatprep.mubr.msk.f32.mxu1 %vm345_vm1, %v4209_v8  ;;  %3674 = vmatprep.mubr.msk.f32.mxu0 %vm345_vm1, %v332_v16  ;;  %v546_v16 = vld [vmem:[#allocation2 + $0x18] sm:$0xff] }
  0x40   : > { %3659 = vmatmul.mubr.msk.f32.gmra.mxu1 %vm345_vm1, %v4224_v11  ;;  %3675 = vmatmul.mubr.msk.f32.gmra.mxu0 %vm345_vm1, %v333_v17  ;;  %v558_v17 = vld [vmem:[#allocation2 + $0x78] sm:$0xff] }
  0x41   : > { %3663 = vmatprep.mubr.msk.f32.mxu1 %vm345_vm1, %v340_v22  ;;  %3677 = vmatprep.mubr.msk.f32.mxu0 %vm345_vm1, %v334_v19 }
  0x44   : > { %3664 = vmatmul.mubr.msk.f32.vlgmr.msra.gmra.mxu1 %vm345_vm1, %v341_v23  ;;  %3678 = vmatmul.mubr.msk.f32.gmra.mxu0 %vm345_vm1, %v335_v20 }
  0x45   : > { %3687 = vmatpush3.msk.msra.mxu1 %vm394_vm0, %v4177_v2  ;;  %3680 = vmatprep.mubr.msk.f32.mxu0 %vm345_vm1, %v4198_v4  ;;  %v1951_v2 = vld [vmem:[%s4303_s8 + $0x2] sm:$0xff]  ;;  %v1953_v4 = vld [vmem:[%s4303_s8 + $0x1a] sm:$0xff]  ;;  %s4051_s8 = smov 88  }
  0x46   : > { %3688 = vmatprep.mubr.msk.f32.mxu1 %vm345_vm1, %v340_v22  ;;  %3694 = vmatprep.subr.msk.mxu1 %vm394_vm0, %v3326_v24  ;;  %v545_v22 = vld [vmem:[#allocation2 + $0x10] sm:$0xff] }
  0x48   : > { %3681 = vmatmul.mubr.msk.f32.gmra.mxu0 %vm345_vm1, %v4205_v6  ;;  %3689 = vmatmul.mubr.msk.f32.vlgmr.msra.gmra.mxu1 %vm345_vm1, %v341_v23  ;;  %v544_v6 = vld [vmem:[#allocation2 + $0x8] sm:$0xff]  ;;  %v557_v23 = vld [vmem:[#allocation2 + $0x70] sm:$0xff] }
  0x49   : > { %3695 = vmatpush3.msk.msra.mxu1 %vm394_vm0, %v3326_v24  ;;  %3683 = vmatprep.mubr.msk.f32.mxu0 %vm345_vm1, %v4209_v8 }
  0x4a   : > { %3691 = vmatprep.mubr.msk.f32.mxu1 %vm345_vm1, %v342_v25  ;;  %3743 = vmatprep.subr.msk.mxu1 %vm394_vm0, %v4217_v9 }
  0x4c   : > { %3684 = vmatmul.mubr.msk.f32.gmra.mxu0 %vm345_vm1, %v4224_v11  ;;  %3692 = vmatmul.mubr.msk.f32.gmra.mxu1 %vm345_vm1, %v343_v26  ;;  %v555_v11 = vld [vmem:[#allocation2 + $0x60] sm:$0xff] }
  0x4d   : > { %3696 = vmatprep.mubr.msk.f32.mxu1 %vm345_vm1, %v1131_v27  ;;  %3722 = vmatprep.mubr.msk.f32.mxu0 %vm345_vm1, %v1133_v28 }
  0x50   : > { %3697 = vmatmul.mubr.msk.f32.vlgmr.msra.gmra.mxu1 %vm345_vm1, %v1132_v29  ;;  %3723 = vmatmul.mubr.msk.f32.vlgmr.msra.gmra.mxu0 %vm345_vm1, %v1134_v30 }
  0x51   : > { %3744 = vmatpush3.msk.msra.mxu1 %vm394_vm0, %v4217_v9  ;;  %3769 = vmatpush3.msk.msra.mxu0 %vm394_vm0, %v4289_v21 }
  0x52   : > { %3699 = vmatprep.mubr.msk.f32.mxu1 %vm345_vm1, %v1133_v28  ;;  %3725 = vmatprep.mubr.msk.f32.mxu0 %vm345_vm1, %v1135_v31  ;;  %v548_v28 = vld [vmem:[#allocation2 + $0x28] sm:$0xff] }
  0x53   : > { %3776 = vmatprep.subr.msk.mxu0 %vm394_vm0, %v3382_v32  ;;  %3748 = vmatprep.subr.msk.mxu1 %vm394_vm0, %v4289_v21 }
  0x54   : > { %3700 = vmatmul.mubr.msk.f32.gmra.mxu1 %vm345_vm1, %v1134_v30  ;;  %3726 = vmatmul.mubr.msk.f32.gmra.mxu0 %vm345_vm1, %v1136_v33 }
  0x55   : > { %3702 = vmatprep.mubr.msk.f32.mxu1 %vm345_vm1, %v1135_v31  ;;  %3728 = vmatprep.mubr.msk.f32.mxu0 %vm345_vm1, %v1137_v34 }
  0x58   : > { %3703 = vmatmul.mubr.msk.f32.gmra.mxu1 %vm345_vm1, %v1136_v33  ;;  %3729 = vmatmul.mubr.msk.f32.gmra.mxu0 %vm345_vm1, %v1138_v35 }
  0x59   : > { %3705 = vmatprep.mubr.msk.f32.mxu1 %vm345_vm1, %v1137_v34  ;;  %3731 = vmatprep.mubr.msk.f32.mxu0 %vm345_vm1, %v1139_v36 }
  0x5c   : > { %3706 = vmatmul.mubr.msk.f32.gmra.mxu1 %vm345_vm1, %v1138_v35  ;;  %3732 = vmatmul.mubr.msk.f32.gmra.mxu0 %vm345_vm1, %v1140_v37 }
  0x5d   : > { %3708 = vmatprep.mubr.msk.f32.mxu1 %vm345_vm1, %v1139_v36  ;;  %3734 = vmatprep.mubr.msk.f32.mxu0 %vm345_vm1, %v1141_v38 }
  0x60   : > { %3709 = vmatmul.mubr.msk.f32.gmra.mxu1 %vm345_vm1, %v1140_v37  ;;  %3735 = vmatmul.mubr.msk.f32.gmra.mxu0 %vm345_vm1, %v1142_v39 }
  0x61   : > { %3711 = vmatprep.mubr.msk.f32.mxu1 %vm345_vm1, %v1141_v38  ;;  %3737 = vmatprep.mubr.msk.f32.mxu0 %vm345_vm1, %v1143_v40 }
  0x64   : > { %3712 = vmatmul.mubr.msk.f32.gmra.mxu1 %vm345_vm1, %v1142_v39  ;;  %3738 = vmatmul.mubr.msk.f32.gmra.mxu0 %vm345_vm1, %v1144_v41 }
  0x65   : > { %3714 = vmatprep.mubr.msk.f32.mxu1 %vm345_vm1, %v1143_v40  ;;  %3740 = vmatprep.mubr.msk.f32.mxu0 %vm345_vm1, %v1145_v42 }
  0x68   : > { %3715 = vmatmul.mubr.msk.f32.gmra.mxu1 %vm345_vm1, %v1144_v41  ;;  %3741 = vmatmul.mubr.msk.f32.gmra.mxu0 %vm345_vm1, %v1146_v43 }
  0x69   : > { %3717 = vmatprep.mubr.msk.f32.mxu1 %vm345_vm1, %v1145_v42  ;;  %3770 = vmatprep.mubr.msk.f32.mxu0 %vm345_vm1, %v1147_v44 }
  0x6c   : > { %3718 = vmatmul.mubr.msk.f32.gmra.mxu1 %vm345_vm1, %v1146_v43  ;;  %3771 = vmatmul.mubr.msk.f32.vlgmr.msra.gmra.mxu0 %vm345_vm1, %v1148_v45 }
  0x6d   : > { %3777 = vmatpush3.msk.msra.mxu0 %vm394_vm0, %v3382_v32  ;;  %3745 = vmatprep.mubr.msk.f32.mxu1 %vm345_vm1, %v1147_v44  ;;  %v549_v44 = vld [vmem:[#allocation2 + $0x30] sm:$0xff] }
  0x6e   : > { %3773 = vmatprep.mubr.msk.f32.mxu0 %vm345_vm1, %v1149_v46  ;;  %3825 = vmatprep.subr.msk.mxu0 %vm394_vm0, %v3400_v48 }
  0x70   : > { %3746 = vmatmul.mubr.msk.f32.vlgmr.msra.gmra.mxu1 %vm345_vm1, %v1148_v45  ;;  %3774 = vmatmul.mubr.msk.f32.gmra.mxu0 %vm345_vm1, %v1150_v47 }
  0x71   : > { %3749 = vmatpush3.msk.msra.mxu1 %vm394_vm0, %v4289_v21  ;;  %3750 = vmatprep.mubr.msk.f32.mxu1 %vm345_vm1, %v1135_v31 }
  0x72   : > { %3778 = vmatprep.mubr.msk.f32.mxu0 %vm345_vm1, %v1935_v49  ;;  %3802 = vmatprep.subr.msk.mxu1 %vm394_vm0, %v3400_v48 }
  0x74   : > { %3751 = vmatmul.mubr.msk.f32.vlgmr.msra.gmra.mxu1 %vm345_vm1, %v1136_v33  ;;  %3779 = vmatmul.mubr.msk.f32.vlgmr.msra.gmra.mxu0 %vm345_vm1, %v1936_v50  ;;  %v547_v33 = vld [vmem:[#allocation2 + $0x20] sm:$0xff]  ;;  %v552_v50 = vld [vmem:[#allocation2 + $0x48] sm:$0xff] }
  0x75   : > { %3803 = vmatpush3.msk.msra.mxu1 %vm394_vm0, %v3400_v48  ;;  %3826 = vmatpush3.msk.msra.mxu0 %vm394_vm0, %v3400_v48 }
  0x76   : > { %3753 = vmatprep.mubr.msk.f32.mxu1 %vm345_vm1, %v1137_v34  ;;  %3781 = vmatprep.mubr.msk.f32.mxu0 %vm345_vm1, %v1937_v51 }
  0x77   : > { %3850 = vmatprep.subr.msk.mxu1 %vm394_vm0, %v3419_v52  ;;  %3830 = vmatprep.subr.msk.mxu0 %vm394_vm0, %v3419_v52 }
  0x78   : > { %3754 = vmatmul.mubr.msk.f32.gmra.mxu1 %vm345_vm1, %v1138_v35  ;;  %3782 = vmatmul.mubr.msk.f32.gmra.mxu0 %vm345_vm1, %v1938_v53 }
  0x79   : > { %3756 = vmatprep.mubr.msk.f32.mxu1 %vm345_vm1, %v1139_v36  ;;  %3784 = vmatprep.mubr.msk.f32.mxu0 %vm345_vm1, %v1939_v54 }
  0x7c   : > { %3757 = vmatmul.mubr.msk.f32.gmra.mxu1 %vm345_vm1, %v1140_v37  ;;  %3785 = vmatmul.mubr.msk.f32.gmra.mxu0 %vm345_vm1, %v1940_v55 }
  0x7d   : > { %3759 = vmatprep.mubr.msk.f32.mxu1 %vm345_vm1, %v1141_v38  ;;  %3787 = vmatprep.mubr.msk.f32.mxu0 %vm345_vm1, %v1941_v56  ;;  %v550_v38 = vld [vmem:[#allocation2 + $0x38] sm:$0xff] }
  0x80   : > { %3760 = vmatmul.mubr.msk.f32.gmra.mxu1 %vm345_vm1, %v1142_v39  ;;  %3788 = vmatmul.mubr.msk.f32.gmra.mxu0 %vm345_vm1, %v1942_v57 }
  0x81   : > { %3762 = vmatprep.mubr.msk.f32.mxu1 %vm345_vm1, %v1143_v40  ;;  %3790 = vmatprep.mubr.msk.f32.mxu0 %vm345_vm1, %v1943_v58 }
  0x84   : > { %3763 = vmatmul.mubr.msk.f32.gmra.mxu1 %vm345_vm1, %v1144_v41  ;;  %3791 = vmatmul.mubr.msk.f32.gmra.mxu0 %vm345_vm1, %v1944_v59 }
  0x85   : > { %3765 = vmatprep.mubr.msk.f32.mxu1 %vm345_vm1, %v1145_v42  ;;  %3793 = vmatprep.mubr.msk.f32.mxu0 %vm345_vm1, %v1945_v60 }
  0x88   : > { %3766 = vmatmul.mubr.msk.f32.gmra.mxu1 %vm345_vm1, %v1146_v43  ;;  %3794 = vmatmul.mubr.msk.f32.gmra.mxu0 %vm345_vm1, %v1946_v61 }
  0x89   : > { %3796 = vmatprep.mubr.msk.f32.mxu0 %vm345_vm1, %v1947_v62  ;;  %3804 = vmatprep.mubr.msk.f32.mxu1 %vm345_vm1, %v1937_v51 }
  0x8c   : > { %3797 = vmatmul.mubr.msk.f32.gmra.mxu0 %vm345_vm1, %v1948_v63  ;;  %3805 = vmatmul.mubr.msk.f32.vlgmr.msra.gmra.mxu1 %vm345_vm1, %v1938_v53 }
  0x8d   : > { %3851 = vmatpush3.msk.msra.mxu1 %vm394_vm0, %v3419_v52  ;;  %3799 = vmatprep.mubr.msk.f32.mxu0 %vm345_vm1, %v1949_v0 }
  0x8e   : > { %3807 = vmatprep.mubr.msk.f32.mxu1 %vm345_vm1, %v1939_v54 }
  0x90   : > { %3800 = vmatmul.mubr.msk.f32.gmra.mxu0 %vm345_vm1, %v1950_v1  ;;  %3808 = vmatmul.mubr.msk.f32.gmra.mxu1 %vm345_vm1, %v1940_v55 }
  0x91   : > { %3810 = vmatprep.mubr.msk.f32.mxu1 %vm345_vm1, %v1941_v56  ;;  %3827 = vmatprep.mubr.msk.f32.mxu0 %vm345_vm1, %v1951_v2 }
  0x94   : > { %3811 = vmatmul.mubr.msk.f32.gmra.mxu1 %vm345_vm1, %v1942_v57  ;;  %3828 = vmatmul.mubr.msk.f32.vlgmr.msra.gmra.mxu0 %vm345_vm1, %v1952_v3 }
  0x95   : > { %3831 = vmatpush3.msk.msra.mxu0 %vm394_vm0, %v3419_v52  ;;  %3813 = vmatprep.mubr.msk.f32.mxu1 %vm345_vm1, %v1943_v58  ;;  %vm3137_vm0 = vcmask 982016  }
  0x96   : > { %3832 = vmatprep.mubr.msk.f32.mxu0 %vm345_vm1, %v1939_v54 }
  0x98   : > { %3814 = vmatmul.mubr.msk.f32.gmra.mxu1 %vm345_vm1, %v1944_v59  ;;  %3833 = vmatmul.mubr.msk.f32.vlgmr.msra.gmra.mxu0 %vm345_vm1, %v1940_v55 }
  0x99   : > { %3816 = vmatprep.mubr.msk.f32.mxu1 %vm345_vm1, %v1945_v60  ;;  %3835 = vmatprep.mubr.msk.f32.mxu0 %vm345_vm1, %v1941_v56  ;;  %v551_v56 = vld [vmem:[#allocation2 + $0x40] sm:$0xff] }
  0x9c   : > { %3817 = vmatmul.mubr.msk.f32.gmra.mxu1 %vm345_vm1, %v1946_v61  ;;  %3836 = vmatmul.mubr.msk.f32.gmra.mxu0 %vm345_vm1, %v1942_v57 }
  0x9d   : > { %3819 = vmatprep.mubr.msk.f32.mxu1 %vm345_vm1, %v1947_v62  ;;  %3838 = vmatprep.mubr.msk.f32.mxu0 %vm345_vm1, %v1943_v58 }
  0xa0   : > { %3820 = vmatmul.mubr.msk.f32.gmra.mxu1 %vm345_vm1, %v1948_v63  ;;  %3839 = vmatmul.mubr.msk.f32.gmra.mxu0 %vm345_vm1, %v1944_v59 }
  0xa1   : > { %3822 = vmatprep.mubr.msk.f32.mxu1 %vm345_vm1, %v1949_v0  ;;  %3841 = vmatprep.mubr.msk.f32.mxu0 %vm345_vm1, %v1945_v60 }
  0xa4   : > { %3823 = vmatmul.mubr.msk.f32.gmra.mxu1 %vm345_vm1, %v1950_v1  ;;  %3842 = vmatmul.mubr.msk.f32.gmra.mxu0 %vm345_vm1, %v1946_v61 }
  0xa5   : > { %3844 = vmatprep.mubr.msk.f32.mxu0 %vm345_vm1, %v1947_v62  ;;  %3852 = vmatprep.mubr.msk.f32.mxu1 %vm345_vm1, %v1951_v2  ;;  %v554_v62 = vld [vmem:[#allocation2 + $0x58] sm:$0xff] }
  0xa8   : > { %3845 = vmatmul.mubr.msk.f32.gmra.mxu0 %vm345_vm1, %v1948_v63  ;;  %3853 = vmatmul.mubr.msk.f32.vlgmr.msra.gmra.mxu1 %vm345_vm1, %v1952_v3 }
  0xa9   : > { %3847 = vmatprep.mubr.msk.f32.mxu0 %vm345_vm1, %v1949_v0  ;;  %3855 = vmatprep.mubr.msk.f32.mxu1 %vm345_vm1, %v1953_v4  ;;  %v553_v4 = vld [vmem:[#allocation2 + $0x50] sm:$0xff] }
  0xac   : > { %3848 = vmatmul.mubr.msk.f32.gmra.mxu0 %vm345_vm1, %v1950_v1  ;;  %3856 = vmatmul.mubr.msk.f32.gmra.mxu1 %vm345_vm1, %v1954_v5 }
  0xe0   : > { %v3616_v8 = vpop.f32.mrf.mxu0  ;;  %v3634_v9 = vpop.f32.mrf.mxu1 }
  0xe1   : > { %v560_v12 = vadd.f32 %v3616_v8, %v544_v6  ;;  %v572_v13 = vadd.f32 %v3634_v9, %v556_v7 }
  0xe2   : > { %v464_v14 = vpop.f32.mrf.mxu0  ;;  %v524_v15 = vpop.f32.mrf.mxu1 }
  0xe3   : > { %576 = vst.msk [vmem:[#allocation2 + $0x8] sm:$0xff] %vm307_vm2, %v560_v12  ;;  %588 = vst.msk [vmem:[#allocation2 + $0x68] sm:$0xff] %vm307_vm2, %v572_v13  ;;  %v559_v18 = vadd.f32 %v543_v10, %v464_v14  ;;  %v571_v19 = vadd.f32 %v555_v11, %v524_v15 }
  0xe4   : > { %v3619_v20 = vpop.f32.mrf.mxu0  ;;  %v3637_v21 = vpop.f32.mrf.mxu1 }
  0xe5   : > { %575 = vst.msk [vmem:[#allocation2] sm:$0xff] %vm307_vm2, %v559_v18  ;;  %587 = vst.msk [vmem:[#allocation2 + $0x60] sm:$0xff] %vm307_vm2, %v571_v19  ;;  %v562_v24 = vadd.f32 %v3619_v20, %v546_v16  ;;  %v574_v25 = vadd.f32 %v3637_v21, %v558_v17 }
  0xe6   : > { %v474_v26 = vpop.f32.mrf.mxu0  ;;  %v534_v27 = vpop.f32.mrf.mxu1 }
  0xe7   : > { %578 = vst.msk [vmem:[#allocation2 + $0x18] sm:$0xff] %vm307_vm2, %v562_v24  ;;  %590 = vst.msk [vmem:[#allocation2 + $0x78] sm:$0xff] %vm307_vm2, %v574_v25  ;;  %v561_v29 = vadd.f32 %v545_v22, %v474_v26  ;;  %v573_v30 = vadd.f32 %v557_v23, %v534_v27 }
  0xe8   : > { %v3622_v31 = vpop.f32.mrf.mxu0  ;;  %v3642_v32 = vpop.f32.mrf.mxu1 }
  0xe9   : > { %577 = vst.msk [vmem:[#allocation2 + $0x10] sm:$0xff] %vm307_vm2, %v561_v29  ;;  %589 = vst.msk [vmem:[#allocation2 + $0x70] sm:$0xff] %vm307_vm2, %v573_v30  ;;  %v564_v34 = vadd.f32 %v3622_v31, %v548_v28 }
  0xea   : > { %v732_v35 = vld [vmem:[#allocation2 + $0x8] sm:$0xff]  ;;  %v484_v36 = vpop.f32.mrf.mxu0  ;;  %v662_v37 = vpop.f32.mrf.mxu1 }
  0xeb   : > { %580 = vst.msk [vmem:[#allocation2 + $0x28] sm:$0xff] %vm307_vm2, %v564_v34  ;;  %v746_v39 = vadd.f32 %v3642_v32, %v732_v35  ;;  %v563_v40 = vadd.f32 %v547_v33, %v484_v36 }
  0xec   : > { %v731_v41 = vld [vmem:[#allocation2] sm:$0xff]  ;;  %v3625_v42 = vpop.f32.mrf.mxu0  ;;  %v3645_v43 = vpop.f32.mrf.mxu1 }
  0xed   : > { %760 = vst.msk [vmem:[#allocation2 + $0x8] sm:$0xff] %vm307_vm2, %v746_v39  ;;  %579 = vst.msk [vmem:[#allocation2 + $0x20] sm:$0xff] %vm307_vm2, %v563_v40  ;;  %v745_v45 = vadd.f32 %v731_v41, %v662_v37  ;;  %v566_v46 = vadd.f32 %v3625_v42, %v550_v38  ;;  %v744_v38 = vld [vmem:[#allocation2 + $0x68] sm:$0xff] }
  0xee   : > { %v734_v47 = vld [vmem:[#allocation2 + $0x18] sm:$0xff]  ;;  %v494_v48 = vpop.f32.mrf.mxu0  ;;  %v672_v49 = vpop.f32.mrf.mxu1 }
  0xef   : > { %759 = vst.msk [vmem:[#allocation2] sm:$0xff] %vm307_vm2, %v745_v45  ;;  %582 = vst.msk [vmem:[#allocation2 + $0x38] sm:$0xff] %vm307_vm2, %v566_v46  ;;  %v748_v51 = vadd.f32 %v3645_v43, %v734_v47  ;;  %v565_v52 = vadd.f32 %v549_v44, %v494_v48  ;;  %v743_v45 = vld [vmem:[#allocation2 + $0x60] sm:$0xff] }
  0xf0   : > { %v733_v53 = vld [vmem:[#allocation2 + $0x10] sm:$0xff]  ;;  %v3628_v54 = vpop.f32.mrf.mxu0  ;;  %v3648_v55 = vpop.f32.mrf.mxu1 }
  0xf1   : > { %762 = vst.msk [vmem:[#allocation2 + $0x18] sm:$0xff] %vm307_vm2, %v748_v51  ;;  %581 = vst.msk [vmem:[#allocation2 + $0x30] sm:$0xff] %vm307_vm2, %v565_v52  ;;  %v747_v57 = vadd.f32 %v733_v53, %v672_v49  ;;  %v568_v58 = vadd.f32 %v3628_v54, %v552_v50  ;;  %v856_v51 = vld [vmem:[#allocation2 + $0x78] sm:$0xff] }
  0xf2   : > { %v736_v59 = vld [vmem:[#allocation2 + $0x28] sm:$0xff]  ;;  %v504_v60 = vpop.f32.mrf.mxu0  ;;  %v682_v61 = vpop.f32.mrf.mxu1 }
  0xf3   : > { %761 = vst.msk [vmem:[#allocation2 + $0x10] sm:$0xff] %vm307_vm2, %v747_v57  ;;  %584 = vst.msk [vmem:[#allocation2 + $0x48] sm:$0xff] %vm307_vm2, %v568_v58  ;;  %v750_v63 = vadd.f32 %v3648_v55, %v736_v59  ;;  %v567_v0 = vadd.f32 %v551_v56, %v504_v60  ;;  %v855_v57 = vld [vmem:[#allocation2 + $0x70] sm:$0xff] }
  0xf4   : > { %v735_v1 = vld [vmem:[#allocation2 + $0x20] sm:$0xff]  ;;  %v3631_v2 = vpop.f32.mrf.mxu0  ;;  %v3651_v3 = vpop.f32.mrf.mxu1  ;;  %v992_v15 = vld [vmem:[#allocation2 + $0x8] sm:$0xff] }
  0xf5   : > { %764 = vst.msk [vmem:[#allocation2 + $0x28] sm:$0xff] %vm307_vm2, %v750_v63  ;;  %583 = vst.msk [vmem:[#allocation2 + $0x40] sm:$0xff] %vm307_vm2, %v567_v0  ;;  %v749_v5 = vadd.f32 %v735_v1, %v682_v61  ;;  %v570_v6 = vadd.f32 %v3631_v2, %v554_v62 }
  0xf6   : > { %v738_v7 = vld [vmem:[#allocation2 + $0x38] sm:$0xff]  ;;  %v514_v8 = vpop.f32.mrf.mxu0  ;;  %v692_v9 = vpop.f32.mrf.mxu1  ;;  %v991_v21 = vld [vmem:[#allocation2] sm:$0xff] }
  0xf7   : > { %763 = vst.msk [vmem:[#allocation2 + $0x20] sm:$0xff] %vm307_vm2, %v749_v5  ;;  %586 = vst.msk [vmem:[#allocation2 + $0x58] sm:$0xff] %vm307_vm2, %v570_v6  ;;  %v752_v10 = vadd.f32 %v3651_v3, %v738_v7  ;;  %v569_v11 = vadd.f32 %v553_v4, %v514_v8 }
  0xf8   : > { %v737_v12 = vld [vmem:[#allocation2 + $0x30] sm:$0xff]  ;;  %v3654_v13 = vpop.f32.mrf.mxu1  ;;  %v3670_v14 = vpop.f32.mrf.mxu0  ;;  %v994_v27 = vld [vmem:[#allocation2 + $0x18] sm:$0xff] }
  0xf9   : > { %766 = vst.msk [vmem:[#allocation2 + $0x38] sm:$0xff] %vm307_vm2, %v752_v10  ;;  %585 = vst.msk [vmem:[#allocation2 + $0x50] sm:$0xff] %vm307_vm2, %v569_v11  ;;  %v751_v16 = vadd.f32 %v737_v12, %v692_v9  ;;  %v1004_v17 = vadd.f32 %v3670_v14, %v992_v15 }
  0xfa   : > { %v740_v18 = vld [vmem:[#allocation2 + $0x48] sm:$0xff]  ;;  %v702_v19 = vpop.f32.mrf.mxu1  ;;  %v932_v20 = vpop.f32.mrf.mxu0  ;;  %v993_v33 = vld [vmem:[#allocation2 + $0x10] sm:$0xff] }
  0xfb   : > { %765 = vst.msk [vmem:[#allocation2 + $0x30] sm:$0xff] %vm307_vm2, %v751_v16  ;;  %v754_v22 = vadd.f32 %v3654_v13, %v740_v18  ;;  %1016 = vst.msk [vmem:[#allocation2 + $0x8] sm:$0xff] %vm307_vm2, %v1004_v17  ;;  %v1003_v23 = vadd.f32 %v991_v21, %v932_v20 }
  0xfc   : > { %v739_v24 = vld [vmem:[#allocation2 + $0x40] sm:$0xff]  ;;  %v3657_v25 = vpop.f32.mrf.mxu1  ;;  %v3673_v26 = vpop.f32.mrf.mxu0  ;;  %v996_v40 = vld [vmem:[#allocation2 + $0x28] sm:$0xff] }
  0xfd   : > { %768 = vst.msk [vmem:[#allocation2 + $0x48] sm:$0xff] %vm307_vm2, %v754_v22  ;;  %v753_v28 = vadd.f32 %v739_v24, %v702_v19  ;;  %1015 = vst.msk [vmem:[#allocation2] sm:$0xff] %vm307_vm2, %v1003_v23  ;;  %v1006_v29 = vadd.f32 %v3673_v26, %v994_v27 }
  0xfe   : > { %v742_v30 = vld [vmem:[#allocation2 + $0x58] sm:$0xff]  ;;  %v712_v31 = vpop.f32.mrf.mxu1  ;;  %v942_v32 = vpop.f32.mrf.mxu0  ;;  %v995_v47 = vld [vmem:[#allocation2 + $0x20] sm:$0xff] }
  0xff   : > { %767 = vst.msk [vmem:[#allocation2 + $0x40] sm:$0xff] %vm307_vm2, %v753_v28  ;;  %v756_v34 = vadd.f32 %v3657_v25, %v742_v30  ;;  %1018 = vst.msk [vmem:[#allocation2 + $0x18] sm:$0xff] %vm307_vm2, %v1006_v29  ;;  %v1005_v35 = vadd.f32 %v993_v33, %v942_v32 }
 0x100   : > { %v741_v36 = vld [vmem:[#allocation2 + $0x50] sm:$0xff]  ;;  %v3660_v37 = vpop.f32.mrf.mxu1  ;;  %v3676_v39 = vpop.f32.mrf.mxu0  ;;  %v998_v53 = vld [vmem:[#allocation2 + $0x38] sm:$0xff] }
 0x101   : > { %770 = vst.msk [vmem:[#allocation2 + $0x58] sm:$0xff] %vm307_vm2, %v756_v34  ;;  %v755_v41 = vadd.f32 %v741_v36, %v712_v31  ;;  %1017 = vst.msk [vmem:[#allocation2 + $0x10] sm:$0xff] %vm307_vm2, %v1005_v35  ;;  %v758_v42 = vadd.f32 %v3660_v37, %v744_v38  ;;  %v1008_v43 = vadd.f32 %v3676_v39, %v996_v40 }
 0x102   : > { %v722_v44 = vpop.f32.mrf.mxu1  ;;  %v952_v46 = vpop.f32.mrf.mxu0  ;;  %v997_v59 = vld [vmem:[#allocation2 + $0x30] sm:$0xff]  ;;  %v1350_v22 = vld [vmem:[#allocation2 + $0x8] sm:$0xff] }
 0x103   : > { %769 = vst.msk [vmem:[#allocation2 + $0x50] sm:$0xff] %vm307_vm2, %v755_v41  ;;  %772 = vst.msk [vmem:[#allocation2 + $0x68] sm:$0xff] %vm307_vm2, %v758_v42  ;;  %v757_v48 = vadd.f32 %v743_v45, %v722_v44  ;;  %v1007_v49 = vadd.f32 %v995_v47, %v952_v46 }
 0x104   : > { %1020 = vst.msk [vmem:[#allocation2 + $0x28] sm:$0xff] %vm307_vm2, %v1008_v43  ;;  %v3665_v50 = vpop.f32.mrf.mxu1  ;;  %v3679_v52 = vpop.f32.mrf.mxu0  ;;  %v1000_v63 = vld [vmem:[#allocation2 + $0x48] sm:$0xff]  ;;  %v1349_v27 = vld [vmem:[#allocation2] sm:$0xff] }
 0x105   : > { %771 = vst.msk [vmem:[#allocation2 + $0x60] sm:$0xff] %vm307_vm2, %v757_v48  ;;  %1019 = vst.msk [vmem:[#allocation2 + $0x20] sm:$0xff] %vm307_vm2, %v1007_v49  ;;  %v858_v54 = vadd.f32 %v3665_v50, %v856_v51  ;;  %v1010_v55 = vadd.f32 %v3679_v52, %v998_v53 }
 0x106   : > { %v845_v56 = vpop.f32.mrf.mxu1  ;;  %v962_v58 = vpop.f32.mrf.mxu0  ;;  %v999_v4 = vld [vmem:[#allocation2 + $0x40] sm:$0xff]  ;;  %v1352_v31 = vld [vmem:[#allocation2 + $0x18] sm:$0xff] }
 0x107   : > { %860 = vst.msk [vmem:[#allocation2 + $0x78] sm:$0xff] %vm307_vm2, %v858_v54  ;;  %1022 = vst.msk [vmem:[#allocation2 + $0x38] sm:$0xff] %vm307_vm2, %v1010_v55  ;;  %v857_v60 = vadd.f32 %v855_v57, %v845_v56  ;;  %v1009_v61 = vadd.f32 %v997_v59, %v962_v58 }
 0x108   : > { %v3682_v62 = vpop.f32.mrf.mxu0  ;;  %v3690_v0 = vpop.f32.mrf.mxu1  ;;  %v1002_v10 = vld [vmem:[#allocation2 + $0x58] sm:$0xff]  ;;  %v1351_v35 = vld [vmem:[#allocation2 + $0x10] sm:$0xff] }
 0x109   : > { %859 = vst.msk [vmem:[#allocation2 + $0x70] sm:$0xff] %vm307_vm2, %v857_v60  ;;  %1021 = vst.msk [vmem:[#allocation2 + $0x30] sm:$0xff] %vm307_vm2, %v1009_v61  ;;  %v1012_v1 = vadd.f32 %v3682_v62, %v1000_v63 }
 0x10a   : > { %v1120_v2 = vld [vmem:[#allocation2 + $0x68] sm:$0xff]  ;;  %v972_v3 = vpop.f32.mrf.mxu0  ;;  %v1099_v5 = vpop.f32.mrf.mxu1  ;;  %v1001_v16 = vld [vmem:[#allocation2 + $0x50] sm:$0xff] }
 0x10b   : > { %1024 = vst.msk [vmem:[#allocation2 + $0x48] sm:$0xff] %vm307_vm2, %v1012_v1  ;;  %v1124_v6 = vadd.f32 %v3690_v0, %v1120_v2  ;;  %v1011_v7 = vadd.f32 %v999_v4, %v972_v3  ;;  %v1354_v39 = vld [vmem:[#allocation2 + $0x28] sm:$0xff] }
 0x10c   : > { %v1119_v8 = vld [vmem:[#allocation2 + $0x60] sm:$0xff]  ;;  %v3685_v9 = vpop.f32.mrf.mxu0  ;;  %v3693_v11 = vpop.f32.mrf.mxu1 }
 0x10d   : > { %1128 = vst.msk [vmem:[#allocation2 + $0x68] sm:$0xff] %vm307_vm2, %v1124_v6  ;;  %1023 = vst.msk [vmem:[#allocation2 + $0x40] sm:$0xff] %vm307_vm2, %v1011_v7  ;;  %v1123_v12 = vadd.f32 %v1119_v8, %v1099_v5  ;;  %v1014_v13 = vadd.f32 %v3685_v9, %v1002_v10  ;;  %v1353_v44 = vld [vmem:[#allocation2 + $0x20] sm:$0xff] }
 0x10e   : > { %v1122_v14 = vld [vmem:[#allocation2 + $0x78] sm:$0xff]  ;;  %v982_v15 = vpop.f32.mrf.mxu0  ;;  %v1109_v17 = vpop.f32.mrf.mxu1 }
 0x10f   : > { %1127 = vst.msk [vmem:[#allocation2 + $0x60] sm:$0xff] %vm307_vm2, %v1123_v12  ;;  %1026 = vst.msk [vmem:[#allocation2 + $0x58] sm:$0xff] %vm307_vm2, %v1014_v13  ;;  %v1126_v18 = vadd.f32 %v3693_v11, %v1122_v14  ;;  %v1013_v19 = vadd.f32 %v1001_v16, %v982_v15  ;;  %v1356_v50 = vld [vmem:[#allocation2 + $0x38] sm:$0xff] }
 0x110   : > { %v1121_v20 = vld [vmem:[#allocation2 + $0x70] sm:$0xff]  ;;  %v3698_v21 = vpop.f32.mrf.mxu1  ;;  %v3724_v23 = vpop.f32.mrf.mxu0 }
 0x111   : > { %1130 = vst.msk [vmem:[#allocation2 + $0x78] sm:$0xff] %vm307_vm2, %v1126_v18  ;;  %1025 = vst.msk [vmem:[#allocation2 + $0x50] sm:$0xff] %vm307_vm2, %v1013_v19  ;;  %v1125_v24 = vadd.f32 %v1121_v20, %v1109_v17  ;;  %v1366_v25 = vadd.f32 %v3698_v21, %v1350_v22  ;;  %v1355_v56 = vld [vmem:[#allocation2 + $0x30] sm:$0xff] }
 0x112   : > { %v1270_v26 = vpop.f32.mrf.mxu1  ;;  %v1468_v28 = vpop.f32.mrf.mxu0  ;;  %v1358_v62 = vld [vmem:[#allocation2 + $0x48] sm:$0xff] }
 0x113   : > { %1129 = vst.msk [vmem:[#allocation2 + $0x70] sm:$0xff] %vm307_vm2, %v1125_v24  ;;  %1382 = vst.msk [vmem:[#allocation2 + $0x8] sm:$0xff] %vm307_vm2, %v1366_v25  ;;  %v1365_v29 = vadd.f32 %v1349_v27, %v1270_v26 }
 0x114   : > { %v3701_v30 = vpop.f32.mrf.mxu1  ;;  %v3727_v32 = vpop.f32.mrf.mxu0  ;;  %v1357_v4 = vld [vmem:[#allocation2 + $0x40] sm:$0xff]  ;;  %v1362_v22 = vld [vmem:[#allocation2 + $0x68] sm:$0xff] }
 0x115   : > { %1381 = vst.msk [vmem:[#allocation2] sm:$0xff] %vm307_vm2, %v1365_v29  ;;  %v1368_v33 = vadd.f32 %v3701_v30, %v1352_v31 }
 0x116   : > { %v1280_v34 = vpop.f32.mrf.mxu1  ;;  %v1478_v36 = vpop.f32.mrf.mxu0  ;;  %v1360_v10 = vld [vmem:[#allocation2 + $0x58] sm:$0xff] }
 0x117   : > { %1384 = vst.msk [vmem:[#allocation2 + $0x18] sm:$0xff] %vm307_vm2, %v1368_v33  ;;  %v1367_v37 = vadd.f32 %v1351_v35, %v1280_v34 }
 0x118   : > { %v3704_v38 = vpop.f32.mrf.mxu1  ;;  %v3730_v40 = vpop.f32.mrf.mxu0  ;;  %v1359_v16 = vld [vmem:[#allocation2 + $0x50] sm:$0xff]  ;;  %v1364_v34 = vld [vmem:[#allocation2 + $0x78] sm:$0xff] }
 0x119   : > { %1383 = vst.msk [vmem:[#allocation2 + $0x10] sm:$0xff] %vm307_vm2, %v1367_v37  ;;  %v1370_v41 = vadd.f32 %v3704_v38, %v1354_v39 }
 0x11a   : > { %v1538_v42 = vld [vmem:[#allocation2 + $0x8] sm:$0xff]  ;;  %v1290_v43 = vpop.f32.mrf.mxu1  ;;  %v1488_v45 = vpop.f32.mrf.mxu0 }
 0x11b   : > { %v1552_v46 = vadd.f32 %v3724_v23, %v1538_v42  ;;  %1386 = vst.msk [vmem:[#allocation2 + $0x28] sm:$0xff] %vm307_vm2, %v1370_v41  ;;  %v1369_v47 = vadd.f32 %v1353_v44, %v1290_v43 }
 0x11c   : > { %v1537_v48 = vld [vmem:[#allocation2] sm:$0xff]  ;;  %v3707_v49 = vpop.f32.mrf.mxu1  ;;  %v3733_v51 = vpop.f32.mrf.mxu0 }
 0x11d   : > { %1566 = vst.msk [vmem:[#allocation2 + $0x8] sm:$0xff] %vm307_vm2, %v1552_v46  ;;  %v1551_v52 = vadd.f32 %v1537_v48, %v1468_v28  ;;  %1385 = vst.msk [vmem:[#allocation2 + $0x20] sm:$0xff] %vm307_vm2, %v1369_v47  ;;  %v1372_v53 = vadd.f32 %v3707_v49, %v1356_v50  ;;  %v1361_v28 = vld [vmem:[#allocation2 + $0x60] sm:$0xff] }
 0x11e   : > { %v1540_v54 = vld [vmem:[#allocation2 + $0x18] sm:$0xff]  ;;  %v1300_v55 = vpop.f32.mrf.mxu1  ;;  %v1498_v57 = vpop.f32.mrf.mxu0 }
 0x11f   : > { %1565 = vst.msk [vmem:[#allocation2] sm:$0xff] %vm307_vm2, %v1551_v52  ;;  %v1554_v58 = vadd.f32 %v3727_v32, %v1540_v54  ;;  %1388 = vst.msk [vmem:[#allocation2 + $0x38] sm:$0xff] %vm307_vm2, %v1372_v53  ;;  %v1371_v59 = vadd.f32 %v1355_v56, %v1300_v55 }
 0x120   : > { %v1539_v60 = vld [vmem:[#allocation2 + $0x10] sm:$0xff]  ;;  %v3710_v61 = vpop.f32.mrf.mxu1  ;;  %v3736_v63 = vpop.f32.mrf.mxu0 }
 0x121   : > { %1568 = vst.msk [vmem:[#allocation2 + $0x18] sm:$0xff] %vm307_vm2, %v1554_v58  ;;  %v1553_v0 = vadd.f32 %v1539_v60, %v1478_v36  ;;  %1387 = vst.msk [vmem:[#allocation2 + $0x30] sm:$0xff] %vm307_vm2, %v1371_v59  ;;  %v1374_v1 = vadd.f32 %v3710_v61, %v1358_v62 }
 0x122   : > { %v1542_v2 = vld [vmem:[#allocation2 + $0x28] sm:$0xff]  ;;  %v1310_v3 = vpop.f32.mrf.mxu1  ;;  %v1508_v5 = vpop.f32.mrf.mxu0 }
 0x123   : > { %1567 = vst.msk [vmem:[#allocation2 + $0x10] sm:$0xff] %vm307_vm2, %v1553_v0  ;;  %v1556_v6 = vadd.f32 %v3730_v40, %v1542_v2  ;;  %1390 = vst.msk [vmem:[#allocation2 + $0x48] sm:$0xff] %vm307_vm2, %v1374_v1  ;;  %v1373_v7 = vadd.f32 %v1357_v4, %v1310_v3  ;;  %v1363_v40 = vld [vmem:[#allocation2 + $0x70] sm:$0xff] }
 0x124   : > { %v1541_v8 = vld [vmem:[#allocation2 + $0x20] sm:$0xff]  ;;  %v3713_v9 = vpop.f32.mrf.mxu1  ;;  %v3739_v11 = vpop.f32.mrf.mxu0  ;;  %v1797_v54 = vld [vmem:[#allocation2 + $0x8] sm:$0xff] }
 0x125   : > { %1570 = vst.msk [vmem:[#allocation2 + $0x28] sm:$0xff] %vm307_vm2, %v1556_v6  ;;  %v1555_v12 = vadd.f32 %v1541_v8, %v1488_v45  ;;  %1389 = vst.msk [vmem:[#allocation2 + $0x40] sm:$0xff] %vm307_vm2, %v1373_v7  ;;  %v1376_v13 = vadd.f32 %v3713_v9, %v1360_v10 }
 0x126   : > { %v1544_v14 = vld [vmem:[#allocation2 + $0x38] sm:$0xff]  ;;  %v1320_v15 = vpop.f32.mrf.mxu1  ;;  %v1518_v17 = vpop.f32.mrf.mxu0  ;;  %v1796_v60 = vld [vmem:[#allocation2] sm:$0xff] }
 0x127   : > { %1569 = vst.msk [vmem:[#allocation2 + $0x20] sm:$0xff] %vm307_vm2, %v1555_v12  ;;  %v1558_v18 = vadd.f32 %v3733_v51, %v1544_v14  ;;  %1392 = vst.msk [vmem:[#allocation2 + $0x58] sm:$0xff] %vm307_vm2, %v1376_v13  ;;  %v1375_v19 = vadd.f32 %v1359_v16, %v1320_v15 }
 0x128   : > { %v1543_v20 = vld [vmem:[#allocation2 + $0x30] sm:$0xff]  ;;  %v3716_v21 = vpop.f32.mrf.mxu1  ;;  %v3742_v23 = vpop.f32.mrf.mxu0  ;;  %v1799_v2 = vld [vmem:[#allocation2 + $0x18] sm:$0xff] }
 0x129   : > { %1572 = vst.msk [vmem:[#allocation2 + $0x38] sm:$0xff] %vm307_vm2, %v1558_v18  ;;  %v1557_v24 = vadd.f32 %v1543_v20, %v1498_v57  ;;  %1391 = vst.msk [vmem:[#allocation2 + $0x50] sm:$0xff] %vm307_vm2, %v1375_v19  ;;  %v1378_v25 = vadd.f32 %v3716_v21, %v1362_v22 }
 0x12a   : > { %v1546_v26 = vld [vmem:[#allocation2 + $0x48] sm:$0xff]  ;;  %v1330_v27 = vpop.f32.mrf.mxu1  ;;  %v1528_v29 = vpop.f32.mrf.mxu0  ;;  %v1798_v7 = vld [vmem:[#allocation2 + $0x10] sm:$0xff] }
 0x12b   : > { %1571 = vst.msk [vmem:[#allocation2 + $0x30] sm:$0xff] %vm307_vm2, %v1557_v24  ;;  %v1560_v30 = vadd.f32 %v3736_v63, %v1546_v26  ;;  %1394 = vst.msk [vmem:[#allocation2 + $0x68] sm:$0xff] %vm307_vm2, %v1378_v25  ;;  %v1377_v31 = vadd.f32 %v1361_v28, %v1330_v27 }
 0x12c   : > { %v1545_v32 = vld [vmem:[#allocation2 + $0x40] sm:$0xff]  ;;  %v3719_v33 = vpop.f32.mrf.mxu1  ;;  %v3772_v35 = vpop.f32.mrf.mxu0  ;;  %v1801_v12 = vld [vmem:[#allocation2 + $0x28] sm:$0xff] }
 0x12d   : > { %1574 = vst.msk [vmem:[#allocation2 + $0x48] sm:$0xff] %vm307_vm2, %v1560_v30  ;;  %v1559_v36 = vadd.f32 %v1545_v32, %v1508_v5  ;;  %1393 = vst.msk [vmem:[#allocation2 + $0x60] sm:$0xff] %vm307_vm2, %v1377_v31  ;;  %v1380_v37 = vadd.f32 %v3719_v33, %v1364_v34 }
 0x12e   : > { %v1548_v38 = vld [vmem:[#allocation2 + $0x58] sm:$0xff]  ;;  %v1340_v39 = vpop.f32.mrf.mxu1  ;;  %v1904_v41 = vpop.f32.mrf.mxu0  ;;  %v1800_v19 = vld [vmem:[#allocation2 + $0x20] sm:$0xff] }
 0x12f   : > { %1573 = vst.msk [vmem:[#allocation2 + $0x40] sm:$0xff] %vm307_vm2, %v1559_v36  ;;  %v1562_v42 = vadd.f32 %v3739_v11, %v1548_v38  ;;  %1396 = vst.msk [vmem:[#allocation2 + $0x78] sm:$0xff] %vm307_vm2, %v1380_v37  ;;  %v1379_v43 = vadd.f32 %v1363_v40, %v1340_v39 }
 0x130   : > { %v1547_v44 = vld [vmem:[#allocation2 + $0x50] sm:$0xff]  ;;  %v3747_v45 = vpop.f32.mrf.mxu1  ;;  %v3775_v46 = vpop.f32.mrf.mxu0  ;;  %v1803_v27 = vld [vmem:[#allocation2 + $0x38] sm:$0xff] }
 0x131   : > { %1576 = vst.msk [vmem:[#allocation2 + $0x58] sm:$0xff] %vm307_vm2, %v1562_v42  ;;  %v1561_v47 = vadd.f32 %v1547_v44, %v1518_v17  ;;  %1395 = vst.msk [vmem:[#allocation2 + $0x70] sm:$0xff] %vm307_vm2, %v1379_v43 }
 0x132   : > { %v1550_v48 = vld [vmem:[#allocation2 + $0x68] sm:$0xff]  ;;  %v1651_v49 = vpop.f32.mrf.mxu1  ;;  %v4581_v50 = vpop.f32.mrf.mxu0 }
 0x133   : > { %1575 = vst.msk [vmem:[#allocation2 + $0x50] sm:$0xff] %vm307_vm2, %v1561_v47  ;;  %v1564_v51 = vadd.f32 %v3742_v23, %v1550_v48 }
 0x134   : > { %v1549_v52 = vld [vmem:[#allocation2 + $0x60] sm:$0xff]  ;;  %v3752_v53 = vpop.f32.mrf.mxu1  ;;  %v3780_v55 = vpop.f32.mrf.mxu0  ;;  %v1805_v42 = vld [vmem:[#allocation2 + $0x48] sm:$0xff] }
 0x135   : > { %1578 = vst.msk [vmem:[#allocation2 + $0x68] sm:$0xff] %vm307_vm2, %v1564_v51  ;;  %v1563_v56 = vadd.f32 %v1549_v52, %v1528_v29  ;;  %v1809_v57 = vadd.f32 %v3752_v53, %v1797_v54 }
 0x136   : > { %v1661_v58 = vld [vmem:[#allocation2 + $0x78] sm:$0xff]  ;;  %v1737_v59 = vpop.f32.mrf.mxu1  ;;  %v2074_v61 = vpop.f32.mrf.mxu0  ;;  %v1804_v48 = vld [vmem:[#allocation2 + $0x40] sm:$0xff] }
 0x137   : > { %1577 = vst.msk [vmem:[#allocation2 + $0x60] sm:$0xff] %vm307_vm2, %v1563_v56  ;;  %v1663_v62 = vadd.f32 %v3747_v45, %v1661_v58  ;;  %1821 = vst.msk [vmem:[#allocation2 + $0x8] sm:$0xff] %vm307_vm2, %v1809_v57  ;;  %v1808_v63 = vadd.f32 %v1796_v60, %v1737_v59 }
 0x138   : > { %v1660_v0 = vld [vmem:[#allocation2 + $0x70] sm:$0xff]  ;;  %v3755_v1 = vpop.f32.mrf.mxu1  ;;  %v3783_v3 = vpop.f32.mrf.mxu0  ;;  %v1807_v54 = vld [vmem:[#allocation2 + $0x58] sm:$0xff] }
 0x139   : > { %1665 = vst.msk [vmem:[#allocation2 + $0x78] sm:$0xff] %vm307_vm2, %v1663_v62  ;;  %v1662_v4 = vadd.f32 %v1660_v0, %v1651_v49  ;;  %1820 = vst.msk [vmem:[#allocation2] sm:$0xff] %vm307_vm2, %v1808_v63  ;;  %v1811_v5 = vadd.f32 %v3755_v1, %v1799_v2 }
 0x13a   : > { %v1747_v6 = vpop.f32.mrf.mxu1  ;;  %v2084_v8 = vpop.f32.mrf.mxu0  ;;  %v1806_v60 = vld [vmem:[#allocation2 + $0x50] sm:$0xff] }
 0x13b   : > { %1664 = vst.msk [vmem:[#allocation2 + $0x70] sm:$0xff] %vm307_vm2, %v1662_v4  ;;  %1823 = vst.msk [vmem:[#allocation2 + $0x18] sm:$0xff] %vm307_vm2, %v1811_v5  ;;  %v1810_v9 = vadd.f32 %v1798_v7, %v1747_v6 }
 0x13c   : > { %v1924_v10 = vld [vmem:[#allocation2 + $0x68] sm:$0xff]  ;;  %v3758_v11 = vpop.f32.mrf.mxu1  ;;  %v3786_v13 = vpop.f32.mrf.mxu0 }
 0x13d   : > { %v1928_v14 = vadd.f32 %v3772_v35, %v1924_v10  ;;  %1822 = vst.msk [vmem:[#allocation2 + $0x10] sm:$0xff] %vm307_vm2, %v1810_v9  ;;  %v1813_v15 = vadd.f32 %v3758_v11, %v1801_v12  ;;  %v1802_v35 = vld [vmem:[#allocation2 + $0x30] sm:$0xff] }
 0x13e   : > { %v1923_v16 = vld [vmem:[#allocation2 + $0x60] sm:$0xff]  ;;  %v2154_v17 = vld [vmem:[#allocation2 + $0x8] sm:$0xff]  ;;  %v1757_v18 = vpop.f32.mrf.mxu1  ;;  %v2094_v20 = vpop.f32.mrf.mxu0 }
 0x13f   : > { %1932 = vst.msk [vmem:[#allocation2 + $0x68] sm:$0xff] %vm307_vm2, %v1928_v14  ;;  %v1927_v21 = vadd.f32 %v1923_v16, %v1904_v41  ;;  %v2170_v22 = vadd.f32 %v3780_v55, %v2154_v17  ;;  %1825 = vst.msk [vmem:[#allocation2 + $0x28] sm:$0xff] %vm307_vm2, %v1813_v15  ;;  %v1812_v23 = vadd.f32 %v1800_v19, %v1757_v18 }
 0x140   : > { %v1926_v24 = vld [vmem:[#allocation2 + $0x78] sm:$0xff]  ;;  %v2153_v25 = vld [vmem:[#allocation2] sm:$0xff]  ;;  %v3761_v26 = vpop.f32.mrf.mxu1  ;;  %v3789_v28 = vpop.f32.mrf.mxu0 }
 0x141   : > { %1931 = vst.msk [vmem:[#allocation2 + $0x60] sm:$0xff] %vm307_vm2, %v1927_v21  ;;  %v1930_v29 = vadd.f32 %v3775_v46, %v1926_v24  ;;  %2186 = vst.msk [vmem:[#allocation2 + $0x8] sm:$0xff] %vm307_vm2, %v2170_v22  ;;  %v2169_v30 = vadd.f32 %v2153_v25, %v2074_v61  ;;  %v1815_v31 = vadd.f32 %v3761_v26, %v1803_v27 }
 0x142   : > { %1824 = vst.msk [vmem:[#allocation2 + $0x20] sm:$0xff] %vm307_vm2, %v1812_v23  ;;  %v1925_v32 = vld [vmem:[#allocation2 + $0x70] sm:$0xff]  ;;  %v2156_v33 = vld [vmem:[#allocation2 + $0x18] sm:$0xff]  ;;  %v1767_v34 = vpop.f32.mrf.mxu1  ;;  %v2104_v36 = vpop.f32.mrf.mxu0 }
 0x143   : > { %1934 = vst.msk [vmem:[#allocation2 + $0x78] sm:$0xff] %vm307_vm2, %v1930_v29  ;;  %v1929_v37 = vadd.f32 %v1925_v32, %v4581_v50  ;;  %2185 = vst.msk [vmem:[#allocation2] sm:$0xff] %vm307_vm2, %v2169_v30  ;;  %v2172_v38 = vadd.f32 %v3783_v3, %v2156_v33  ;;  %v1814_v39 = vadd.f32 %v1802_v35, %v1767_v34 }
 0x144   : > { %1827 = vst.msk [vmem:[#allocation2 + $0x38] sm:$0xff] %vm307_vm2, %v1815_v31  ;;  %v2155_v40 = vld [vmem:[#allocation2 + $0x10] sm:$0xff]  ;;  %v3764_v41 = vpop.f32.mrf.mxu1  ;;  %v3792_v43 = vpop.f32.mrf.mxu0 }
 0x145   : > { %1933 = vst.msk [vmem:[#allocation2 + $0x70] sm:$0xff] %vm307_vm2, %v1929_v37  ;;  %2188 = vst.msk [vmem:[#allocation2 + $0x18] sm:$0xff] %vm307_vm2, %v2172_v38  ;;  %v2171_v44 = vadd.f32 %v2155_v40, %v2084_v8  ;;  %v1817_v45 = vadd.f32 %v3764_v41, %v1805_v42 }
 0x146   : > { %1826 = vst.msk [vmem:[#allocation2 + $0x30] sm:$0xff] %vm307_vm2, %v1814_v39  ;;  %v2158_v46 = vld [vmem:[#allocation2 + $0x28] sm:$0xff]  ;;  %v1777_v47 = vpop.f32.mrf.mxu1  ;;  %v2114_v49 = vpop.f32.mrf.mxu0 }
 0x147   : > { %2187 = vst.msk [vmem:[#allocation2 + $0x10] sm:$0xff] %vm307_vm2, %v2171_v44  ;;  %v2174_v50 = vadd.f32 %v3786_v13, %v2158_v46  ;;  %1829 = vst.msk [vmem:[#allocation2 + $0x48] sm:$0xff] %vm307_vm2, %v1817_v45  ;;  %v1816_v51 = vadd.f32 %v1804_v48, %v1777_v47  ;;  %v2166_v2 = vld [vmem:[#allocation2 + $0x68] sm:$0xff] }
 0x148   : > { %v3767_v53 = vpop.f32.mrf.mxu1  ;;  %v3795_v55 = vpop.f32.mrf.mxu0  ;;  %v2342_v4 = vld [vmem:[#allocation2 + $0x8] sm:$0xff]  ;;  %v2165_v10 = vld [vmem:[#allocation2 + $0x60] sm:$0xff] }
 0x149   : > { %v2157_v52 = vld [vmem:[#allocation2 + $0x20] sm:$0xff]  ;;  %2190 = vst.msk [vmem:[#allocation2 + $0x28] sm:$0xff] %vm307_vm2, %v2174_v50  ;;  %1828 = vst.msk [vmem:[#allocation2 + $0x40] sm:$0xff] %vm307_vm2, %v1816_v51  ;;  %v1819_v57 = vadd.f32 %v3767_v53, %v1807_v54 }
 0x14a   : > { %v2173_v56 = vadd.f32 %v2157_v52, %v2094_v20  ;;  %v1787_v59 = vpop.f32.mrf.mxu1  ;;  %v2124_v61 = vpop.f32.mrf.mxu0  ;;  %v2341_v12 = vld [vmem:[#allocation2] sm:$0xff]  ;;  %v2168_v18 = vld [vmem:[#allocation2 + $0x78] sm:$0xff] }
 0x14b   : > { %v2160_v58 = vld [vmem:[#allocation2 + $0x38] sm:$0xff]  ;;  %1831 = vst.msk [vmem:[#allocation2 + $0x58] sm:$0xff] %vm307_vm2, %v1819_v57  ;;  %v1818_v63 = vadd.f32 %v1806_v60, %v1787_v59 }
 0x14c   : > { %2189 = vst.msk [vmem:[#allocation2 + $0x20] sm:$0xff] %vm307_vm2, %v2173_v56  ;;  %v2176_v62 = vadd.f32 %v3789_v28, %v2160_v58  ;;  %v3798_v1 = vpop.f32.mrf.mxu0  ;;  %v3806_v3 = vpop.f32.mrf.mxu1  ;;  %v2344_v20 = vld [vmem:[#allocation2 + $0x18] sm:$0xff]  ;;  %v2167_v26 = vld [vmem:[#allocation2 + $0x70] sm:$0xff] }
 0x14d   : > { %v2159_v0 = vld [vmem:[#allocation2 + $0x30] sm:$0xff]  ;;  %1830 = vst.msk [vmem:[#allocation2 + $0x50] sm:$0xff] %vm307_vm2, %v1818_v63  ;;  %v2182_v6 = vadd.f32 %v3798_v1, %v2166_v2  ;;  %v2356_v7 = vadd.f32 %v3806_v3, %v2342_v4 }
 0x14e   : > { %2192 = vst.msk [vmem:[#allocation2 + $0x38] sm:$0xff] %vm307_vm2, %v2176_v62  ;;  %v2175_v5 = vadd.f32 %v2159_v0, %v2104_v36  ;;  %v2162_v8 = vld [vmem:[#allocation2 + $0x48] sm:$0xff]  ;;  %v2134_v9 = vpop.f32.mrf.mxu0  ;;  %v2272_v11 = vpop.f32.mrf.mxu1  ;;  %v2343_v28 = vld [vmem:[#allocation2 + $0x10] sm:$0xff] }
 0x14f   : > { %v2178_v13 = vadd.f32 %v3792_v43, %v2162_v8  ;;  %2198 = vst.msk [vmem:[#allocation2 + $0x68] sm:$0xff] %vm307_vm2, %v2182_v6  ;;  %2370 = vst.msk [vmem:[#allocation2 + $0x8] sm:$0xff] %vm307_vm2, %v2356_v7  ;;  %v2181_v14 = vadd.f32 %v2165_v10, %v2134_v9  ;;  %v2355_v15 = vadd.f32 %v2341_v12, %v2272_v11 }
 0x150   : > { %2191 = vst.msk [vmem:[#allocation2 + $0x30] sm:$0xff] %vm307_vm2, %v2175_v5  ;;  %v2161_v16 = vld [vmem:[#allocation2 + $0x40] sm:$0xff]  ;;  %v3801_v17 = vpop.f32.mrf.mxu0  ;;  %v3809_v19 = vpop.f32.mrf.mxu1  ;;  %v2346_v34 = vld [vmem:[#allocation2 + $0x28] sm:$0xff] }
 0x151   : > { %2194 = vst.msk [vmem:[#allocation2 + $0x48] sm:$0xff] %vm307_vm2, %v2178_v13  ;;  %v2177_v21 = vadd.f32 %v2161_v16, %v2114_v49  ;;  %2197 = vst.msk [vmem:[#allocation2 + $0x60] sm:$0xff] %vm307_vm2, %v2181_v14  ;;  %v2184_v22 = vadd.f32 %v3801_v17, %v2168_v18  ;;  %v2358_v23 = vadd.f32 %v3809_v19, %v2344_v20 }
 0x152   : > { %2369 = vst.msk [vmem:[#allocation2] sm:$0xff] %vm307_vm2, %v2355_v15  ;;  %v2164_v24 = vld [vmem:[#allocation2 + $0x58] sm:$0xff]  ;;  %v2144_v25 = vpop.f32.mrf.mxu0  ;;  %v2282_v27 = vpop.f32.mrf.mxu1 }
 0x153   : > { %2193 = vst.msk [vmem:[#allocation2 + $0x40] sm:$0xff] %vm307_vm2, %v2177_v21  ;;  %v2180_v29 = vadd.f32 %v3795_v55, %v2164_v24  ;;  %2200 = vst.msk [vmem:[#allocation2 + $0x78] sm:$0xff] %vm307_vm2, %v2184_v22  ;;  %v2183_v30 = vadd.f32 %v2167_v26, %v2144_v25  ;;  %v2357_v31 = vadd.f32 %v2343_v28, %v2282_v27  ;;  %v2345_v39 = vld [vmem:[#allocation2 + $0x20] sm:$0xff] }
 0x154   : > { %2372 = vst.msk [vmem:[#allocation2 + $0x18] sm:$0xff] %vm307_vm2, %v2358_v23  ;;  %v2163_v32 = vld [vmem:[#allocation2 + $0x50] sm:$0xff]  ;;  %v3812_v33 = vpop.f32.mrf.mxu1  ;;  %v3829_v35 = vpop.f32.mrf.mxu0 }
 0x155   : > { %2196 = vst.msk [vmem:[#allocation2 + $0x58] sm:$0xff] %vm307_vm2, %v2180_v29  ;;  %v2179_v36 = vadd.f32 %v2163_v32, %v2124_v61  ;;  %2199 = vst.msk [vmem:[#allocation2 + $0x70] sm:$0xff] %vm307_vm2, %v2183_v30  ;;  %v2360_v37 = vadd.f32 %v3812_v33, %v2346_v34  ;;  %v2348_v43 = vld [vmem:[#allocation2 + $0x38] sm:$0xff] }
 0x156   : > { %2371 = vst.msk [vmem:[#allocation2 + $0x10] sm:$0xff] %vm307_vm2, %v2357_v31  ;;  %v2292_v38 = vpop.f32.mrf.mxu1  ;;  %v2455_v40 = vpop.f32.mrf.mxu0  ;;  %v2601_v45 = vld [vmem:[#allocation2 + $0x8] sm:$0xff] }
 0x157   : > { %2195 = vst.msk [vmem:[#allocation2 + $0x50] sm:$0xff] %vm307_vm2, %v2179_v36  ;;  %2374 = vst.msk [vmem:[#allocation2 + $0x28] sm:$0xff] %vm307_vm2, %v2360_v37  ;;  %v2359_v41 = vadd.f32 %v2345_v39, %v2292_v38  ;;  %v2347_v50 = vld [vmem:[#allocation2 + $0x30] sm:$0xff]  ;;  %v2354_v19 = vld [vmem:[#allocation2 + $0x68] sm:$0xff] }
 0x158   : > { %v3815_v42 = vpop.f32.mrf.mxu1  ;;  %v3834_v44 = vpop.f32.mrf.mxu0  ;;  %v2350_v58 = vld [vmem:[#allocation2 + $0x48] sm:$0xff]  ;;  %v2353_v25 = vld [vmem:[#allocation2 + $0x60] sm:$0xff] }
 0x159   : > { %2373 = vst.msk [vmem:[#allocation2 + $0x20] sm:$0xff] %vm307_vm2, %v2359_v41  ;;  %v2362_v46 = vadd.f32 %v3815_v42, %v2348_v43  ;;  %v2613_v47 = vadd.f32 %v3834_v44, %v2601_v45  ;;  %v2600_v52 = vld [vmem:[#allocation2] sm:$0xff] }
 0x15a   : > { %v2465_v48 = vld [vmem:[#allocation2 + $0x78] sm:$0xff]  ;;  %v2302_v49 = vpop.f32.mrf.mxu1  ;;  %v2541_v51 = vpop.f32.mrf.mxu0  ;;  %v2349_v1 = vld [vmem:[#allocation2 + $0x40] sm:$0xff] }
 0x15b   : > { %v2467_v53 = vadd.f32 %v3829_v35, %v2465_v48  ;;  %2376 = vst.msk [vmem:[#allocation2 + $0x38] sm:$0xff] %vm307_vm2, %v2362_v46  ;;  %2625 = vst.msk [vmem:[#allocation2 + $0x8] sm:$0xff] %vm307_vm2, %v2613_v47  ;;  %v2361_v54 = vadd.f32 %v2347_v50, %v2302_v49  ;;  %v2612_v55 = vadd.f32 %v2600_v52, %v2541_v51  ;;  %v2603_v60 = vld [vmem:[#allocation2 + $0x18] sm:$0xff]  ;;  %v4047_v50 = vmov 1983009808  }
 0x15c   : > { %v2464_v56 = vld [vmem:[#allocation2 + $0x70] sm:$0xff]  ;;  %v3818_v57 = vpop.f32.mrf.mxu1  ;;  %v3837_v59 = vpop.f32.mrf.mxu0  ;;  %v2352_v7 = vld [vmem:[#allocation2 + $0x58] sm:$0xff]  ;;  %v2781_v51 = vunpack.c.l.s4 %v4047_v50  ;;  %v2783_v52 = vlaneseq }
 0x15d   : > { %2469 = vst.msk [vmem:[#allocation2 + $0x78] sm:$0xff] %vm307_vm2, %v2467_v53  ;;  %v2466_v61 = vadd.f32 %v2464_v56, %v2455_v40  ;;  %2375 = vst.msk [vmem:[#allocation2 + $0x30] sm:$0xff] %vm307_vm2, %v2361_v54  ;;  %v2364_v62 = vadd.f32 %v3818_v57, %v2350_v58  ;;  %v2615_v63 = vadd.f32 %v3837_v59, %v2603_v60  ;;  %v2602_v3 = vld [vmem:[#allocation2 + $0x10] sm:$0xff]  ;;  %v3438_v58 = vld [vmem:[%s4798_s3] ss:$0 sm:$0xff] }
 0x15e   : > { %2624 = vst.msk [vmem:[#allocation2] sm:$0xff] %vm307_vm2, %v2612_v55  ;;  %v2312_v0 = vpop.f32.mrf.mxu1  ;;  %v2551_v2 = vpop.f32.mrf.mxu0  ;;  %v2605_v9 = vld [vmem:[#allocation2 + $0x28] sm:$0xff]  ;;  %v2351_v13 = vld [vmem:[#allocation2 + $0x50] sm:$0xff] }
 0x15f   : > { %2468 = vst.msk [vmem:[#allocation2 + $0x70] sm:$0xff] %vm307_vm2, %v2466_v61  ;;  %2378 = vst.msk [vmem:[#allocation2 + $0x48] sm:$0xff] %vm307_vm2, %v2364_v62  ;;  %v2363_v4 = vadd.f32 %v2349_v1, %v2312_v0  ;;  %v2614_v5 = vadd.f32 %v2602_v3, %v2551_v2  ;;  %v2782_v1 = vunpack.c.0.s8 %v2781_v51  ;;  %v2784_v2 = vshrl.u32 %v2783_v52, 7 }
 0x160   : > { %2627 = vst.msk [vmem:[#allocation2 + $0x18] sm:$0xff] %vm307_vm2, %v2615_v63  ;;  %v3821_v6 = vpop.f32.mrf.mxu1  ;;  %v3840_v8 = vpop.f32.mrf.mxu0  ;;  %v2604_v15 = vld [vmem:[#allocation2 + $0x20] sm:$0xff]  ;;  %v4048_v3 = vmov 1934713408  }
 0x161   : > { %2377 = vst.msk [vmem:[#allocation2 + $0x40] sm:$0xff] %vm307_vm2, %v2363_v4  ;;  %2626 = vst.msk [vmem:[#allocation2 + $0x10] sm:$0xff] %vm307_vm2, %v2614_v5  ;;  %v2366_v10 = vadd.f32 %v3821_v6, %v2352_v7  ;;  %v2617_v11 = vadd.f32 %v3840_v8, %v2605_v9  ;;  %v2845_v4 = vunpack.c.l.s4 %v4048_v3 }
 0x162   : > { %v2322_v12 = vpop.f32.mrf.mxu1  ;;  %v2561_v14 = vpop.f32.mrf.mxu0  ;;  %v2607_v21 = vld [vmem:[#allocation2 + $0x38] sm:$0xff]  ;;  %v2740_v62 = vld [vmem:[#allocation2 + $0x8] sm:$0xff] }
 0x163   : > { %2380 = vst.msk [vmem:[#allocation2 + $0x58] sm:$0xff] %vm307_vm2, %v2366_v10  ;;  %2629 = vst.msk [vmem:[#allocation2 + $0x28] sm:$0xff] %vm307_vm2, %v2617_v11  ;;  %v2365_v16 = vadd.f32 %v2351_v13, %v2322_v12  ;;  %v2616_v17 = vadd.f32 %v2604_v15, %v2561_v14  ;;  %v4662_v6 = vadd.f32 %v3438_v58, %v2740_v62 }
 0x164   : > { %v3824_v18 = vpop.f32.mrf.mxu1  ;;  %v3843_v20 = vpop.f32.mrf.mxu0  ;;  %v2606_v27 = vld [vmem:[#allocation2 + $0x30] sm:$0xff]  ;;  %v2730_v41 = vld [vmem:[#allocation2 + $0x78] sm:$0xff]  ;;  %v4666_v13 = vsub.s32 %v2782_v1, %v2784_v2 }
 0x165   : > { %2379 = vst.msk [vmem:[#allocation2 + $0x50] sm:$0xff] %vm307_vm2, %v2365_v16  ;;  %2628 = vst.msk [vmem:[#allocation2 + $0x20] sm:$0xff] %vm307_vm2, %v2616_v17  ;;  %v2368_v22 = vadd.f32 %v3824_v18, %v2354_v19  ;;  %v2619_v23 = vadd.f32 %v3843_v20, %v2607_v21  ;;  %v2846_v18 = vunpack.c.0.s8 %v2845_v4  ;;  %v2739_v19 = vld [vmem:[#allocation2] sm:$0xff] }
 0x166   : > { %v2332_v24 = vpop.f32.mrf.mxu1  ;;  %v2571_v26 = vpop.f32.mrf.mxu0  ;;  %v2609_v31 = vld [vmem:[#allocation2 + $0x48] sm:$0xff]  ;;  %v2729_v44 = vld [vmem:[#allocation2 + $0x70] sm:$0xff] }
 0x167   : > { %2382 = vst.msk [vmem:[#allocation2 + $0x68] sm:$0xff] %vm307_vm2, %v2368_v22  ;;  %2631 = vst.msk [vmem:[#allocation2 + $0x38] sm:$0xff] %vm307_vm2, %v2619_v23  ;;  %v2367_v28 = vadd.f32 %v2353_v25, %v2332_v24  ;;  %v2618_v29 = vadd.f32 %v2606_v27, %v2571_v26  ;;  %v2742_v56 = vld [vmem:[#allocation2 + $0x18] sm:$0xff] }
 0x168   : > { %v3846_v30 = vpop.f32.mrf.mxu0  ;;  %v3854_v32 = vpop.f32.mrf.mxu1  ;;  %v2608_v35 = vld [vmem:[#allocation2 + $0x40] sm:$0xff]  ;;  %v4657_v63 = vadd.f32 %v3438_v58, %v2742_v56  ;;  %v2741_v9 = vld [vmem:[#allocation2 + $0x10] sm:$0xff] }
 0x169   : > { %2381 = vst.msk [vmem:[#allocation2 + $0x60] sm:$0xff] %vm307_vm2, %v2367_v28  ;;  %2630 = vst.msk [vmem:[#allocation2 + $0x30] sm:$0xff] %vm307_vm2, %v2618_v29  ;;  %v2621_v33 = vadd.f32 %v3846_v30, %v2609_v31  ;;  %v2764_v26 = vadd.f32 %v3438_v58, %v2741_v9 }
 0x16a   : > { %v2581_v34 = vpop.f32.mrf.mxu0  ;;  %v2708_v36 = vpop.f32.mrf.mxu1  ;;  %v2611_v39 = vld [vmem:[#allocation2 + $0x58] sm:$0xff]  ;;  %v2744_v57 = vld [vmem:[#allocation2 + $0x28] sm:$0xff] }
 0x16b   : > { %2633 = vst.msk [vmem:[#allocation2 + $0x48] sm:$0xff] %vm307_vm2, %v2621_v33  ;;  %v2620_v37 = vadd.f32 %v2608_v35, %v2581_v34  ;;  %v4659_v0 = vadd.f32 %v3438_v58, %v2744_v57  ;;  %v2762_v34 = vadd.f32 %v3438_v58, %v2739_v19 }
 0x16c   : > { %v3849_v38 = vpop.f32.mrf.mxu0  ;;  %v3857_v40 = vpop.f32.mrf.mxu1  ;;  %v2610_v47 = vld [vmem:[#allocation2 + $0x50] sm:$0xff]  ;;  %v2743_v10 = vld [vmem:[#allocation2 + $0x20] sm:$0xff] }
 0x16d   : > { %2632 = vst.msk [vmem:[#allocation2 + $0x40] sm:$0xff] %vm307_vm2, %v2620_v37  ;;  %v2623_v42 = vadd.f32 %v3849_v38, %v2611_v39  ;;  %v2734_v43 = vadd.f32 %v3857_v40, %v2730_v41  ;;  %v2914_v14 = vcombine.low %v4662_v6, %v4659_v0  ;;  %v2766_v27 = vadd.f32 %v3438_v58, %v2743_v10 }
 0x16e   : > { %v2728_v45 = vld [vmem:[#allocation2 + $0x68] sm:$0xff]  ;;  %v2591_v46 = vpop.f32.mrf.mxu0  ;;  %v2718_v48 = vpop.f32.mrf.mxu1  ;;  %v2746_v49 = vld [vmem:[#allocation2 + $0x38] sm:$0xff]  ;;  %v4684_v40 = vsub.s32 %v2846_v18, %v2784_v2 }
 0x16f   : > { %v2732_v53 = vadd.f32 %v3854_v32, %v2728_v45  ;;  %2635 = vst.msk [vmem:[#allocation2 + $0x58] sm:$0xff] %vm307_vm2, %v2623_v42  ;;  %2738 = vst.msk [vmem:[#allocation2 + $0x78] sm:$0xff] %vm307_vm2, %v2734_v43  ;;  %v2622_v54 = vadd.f32 %v2610_v47, %v2591_v46  ;;  %v2733_v55 = vadd.f32 %v2729_v44, %v2718_v48 }
 0x170   : > { %v2727_v59 = vld [vmem:[#allocation2 + $0x60] sm:$0xff]  ;;  %v4652_v60 = vadd.f32 %v3438_v58, %v2746_v49  ;;  %v2745_v5 = vld [vmem:[#allocation2 + $0x30] sm:$0xff]  ;;  %v2922_v32 = vrot.slane %v2914_v14, %v4666_v13  ;;  %v2778_v41 = vcombine.low %v2762_v34, %v2766_v27 }
 0x171   : > { %2736 = vst.msk [vmem:[#allocation2 + $0x68] sm:$0xff] %vm307_vm2, %v2732_v53  ;;  %v2731_v61 = vadd.f32 %v2727_v59, %v2708_v36  ;;  %2634 = vst.msk [vmem:[#allocation2 + $0x50] sm:$0xff] %vm307_vm2, %v2622_v54  ;;  %v2768_v15 = vadd.f32 %v3438_v58, %v2745_v5 }
 0x172   : > { %2737 = vst.msk [vmem:[#allocation2 + $0x70] sm:$0xff] %vm307_vm2, %v2733_v55  ;;  %v2930_v7 = vcombine.low %v4657_v63, %v4652_v60  ;;  %v2748_v8 = vld [vmem:[#allocation2 + $0x48] sm:$0xff]  ;;  %v2786_v53 = vrot.slane %v2778_v41, %v4666_v13 }
 0x173   : > { %2735 = vst.msk [vmem:[#allocation2 + $0x60] sm:$0xff] %vm307_vm2, %v2731_v61  ;;  %v4674_v22 = vadd.f32 %v3438_v58, %v2748_v8  ;;  %v2794_v35 = vcombine.low %v2764_v26, %v2768_v15  ;;  %v2795_v54 = vcombine.high %v2764_v26, %v2768_v15  ;;  %v2779_v61 = vcombine.high %v2762_v34, %v2766_v27 }
 0x174   : > { %v2747_v20 = vld [vmem:[#allocation2 + $0x40] sm:$0xff]  ;;  %v2938_v23 = vrot.slane %v2930_v7, %v4666_v13  ;;  %v2915_v26 = vcombine.high %v4662_v6, %v4659_v0 }
 0x175   : > { %v2770_v37 = vadd.f32 %v3438_v58, %v2747_v20  ;;  %v2802_v46 = vrot.slane %v2794_v35, %v4666_v13  ;;  %v2809_v7 = vrot.slane %v2795_v54, %v4666_v13 }
 0x176   : > { %v2750_v11 = vld [vmem:[#allocation2 + $0x58] sm:$0xff]  ;;  %v2978_v44 = vcombine.low %v2922_v32, %v2938_v23  ;;  %v2979_v52 = vcombine.high %v2922_v32, %v2938_v23  ;;  %v2929_v6 = vrot.slane %v2915_v26, %v4666_v13 }
 0x177   : > { %v2754_v12 = vld [vmem:[#allocation2 + $0x78] sm:$0xff]  ;;  %v4670_v16 = vadd.f32 %v3438_v58, %v2750_v11  ;;  %v2842_v59 = vcombine.low %v2786_v53, %v2802_v46  ;;  %v2843_v9 = vcombine.high %v2786_v53, %v2802_v46 }
 0x178   : > { %v4672_v17 = vadd.f32 %v3438_v58, %v2754_v12  ;;  %v2752_v21 = vld [vmem:[#allocation2 + $0x68] sm:$0xff]  ;;  %v2749_v24 = vld [vmem:[#allocation2 + $0x50] sm:$0xff]  ;;  %v2986_v55 = vrot.slane %v2978_v44, %v4684_v40  ;;  %v2993_v8 = vrot.slane %v2979_v52, %v4684_v40  ;;  %v2793_v12 = vrot.slane %v2779_v61, %v4666_v13 }
 0x179   : > { %v2753_v25 = vld [vmem:[#allocation2 + $0x70] sm:$0xff]  ;;  %v4677_v28 = vadd.f32 %v3438_v58, %v2752_v21  ;;  %v2772_v30 = vadd.f32 %v3438_v58, %v2749_v24  ;;  %v4703_v11 = vrot.slane %v2842_v59, %v4684_v40  ;;  %v2931_v21 = vcombine.high %v4657_v63, %v4652_v60 }
 0x17a   : > { %v2962_v29 = vcombine.low %v4670_v16, %v4672_v17  ;;  %v2776_v31 = vadd.f32 %v3438_v58, %v2753_v25  ;;  %v2751_v33 = vld [vmem:[#allocation2 + $0x60] sm:$0xff]  ;;  %v2857_v24 = vrot.slane %v2843_v9, %v4684_v40  ;;  %v2858_v25 = vcombine.low %v2793_v12, %v2809_v7 }
 0x17b   : > { %v2946_v36 = vcombine.low %v4674_v22, %v4677_v28  ;;  %v2774_v38 = vadd.f32 %v3438_v58, %v2751_v33  ;;  %v2947_v14 = vcombine.high %v4674_v22, %v4677_v28  ;;  %v2963_v22 = vcombine.high %v4670_v16, %v4672_v17 }
 0x17c   : > { %v2826_v39 = vcombine.low %v2772_v30, %v2776_v31  ;;  %v2970_v43 = vrot.slane %v2962_v29, %v4666_v13  ;;  %v2827_v58 = vcombine.high %v2772_v30, %v2776_v31  ;;  %v2945_v30 = vrot.slane %v2931_v21, %v4666_v13 }
 0x17d   : > { %v2954_v42 = vrot.slane %v2946_v36, %v4666_v13  ;;  %v2810_v45 = vcombine.low %v2770_v37, %v2774_v38  ;;  %v2811_v47 = vcombine.high %v2770_v37, %v2774_v38  ;;  %v2961_v27 = vrot.slane %v2947_v14, %v4666_v13 }
 0x17e   : > { %v2834_v51 = vrot.slane %v2826_v39, %v4666_v13  ;;  %v2841_v10 = vrot.slane %v2827_v58, %v4666_v13  ;;  %v2866_v16 = vrot.slane %v2858_v25, %v4684_v40  ;;  %v2859_v17 = vcombine.high %v2793_v12, %v2809_v7 }
 0x17f   : > { %v3010_v48 = vcombine.low %v2954_v42, %v2970_v43  ;;  %v3011_v49 = vcombine.high %v2954_v42, %v2970_v43  ;;  %v2818_v50 = vrot.slane %v2810_v45, %v4666_v13  ;;  %v2825_v62 = vrot.slane %v2811_v47, %v4666_v13 }
 0x180   : > { %v2977_v0 = vrot.slane %v2963_v22, %v4666_v13  ;;  %v2873_v35 = vrot.slane %v2859_v17, %v4684_v40  ;;  %v2994_v36 = vcombine.low %v2929_v6, %v2945_v30  ;;  %v2995_v42 = vcombine.high %v2929_v6, %v2945_v30 }
 0x181   : > { %v3018_v56 = vrot.slane %v3010_v48, %v4684_v40  ;;  %v2874_v57 = vcombine.low %v2818_v50, %v2834_v51  ;;  %v3025_v3 = vrot.slane %v3011_v49, %v4684_v40  ;;  %v2875_v4 = vcombine.high %v2818_v50, %v2834_v51 }
 0x182   : > { %v2890_v20 = vcombine.low %v2825_v62, %v2841_v10  ;;  %v2891_v29 = vcombine.high %v2825_v62, %v2841_v10  ;;  %v3026_v34 = vcombine.low %v2961_v27, %v2977_v0  ;;  %v3027_v41 = vcombine.high %v2961_v27, %v2977_v0 }
 0x183   : > { %v3043_v1 = vcombine.high %v2986_v55, %v3018_v56  ;;  %v3042_v2 = vcombine.low %v2986_v55, %v3018_v56  ;;  %v4697_v5 = vrot.slane %v2874_v57, %v4684_v40  ;;  %v3045_v15 = vcombine.high %v2993_v8, %v3025_v3 }
 0x184   : > { %v3044_v18 = vcombine.low %v2993_v8, %v3025_v3  ;;  %v2889_v19 = vrot.slane %v2875_v4, %v4684_v40  ;;  %v2898_v63 = vrot.slane %v2890_v20, %v4684_v40  ;;  %v2905_v33 = vrot.slane %v2891_v29, %v4684_v40 }
 0x185   : > { %3083 = vrot.lane.b32.xlu0 %v3043_v1, %s4049_s23  ;;  %3079 = vrot.lane.b32.xlu1 %v3042_v2, %s4050_s27  ;;  %v2906_v23 = vcombine.low %v4703_v11, %v4697_v5  ;;  %v2907_v60 = vcombine.high %v4703_v11, %v4697_v5  ;;  %v3034_v39 = vrot.slane %v3026_v34, %v4684_v40  ;;  %s4062_s23 = smov 104   ;;  %s4063_s27 = smov 120  }
 0x186   : > { %v2909_v28 = vcombine.high %v2857_v24, %v2889_v19  ;;  %v2910_v31 = vcombine.low %v2866_v16, %v2898_v63  ;;  %v2908_v32 = vcombine.low %v2857_v24, %v2889_v19  ;;  %v2912_v37 = vcombine.low %v2873_v35, %v2905_v33 }
 0x187   : > { %v2911_v38 = vcombine.high %v2866_v16, %v2898_v63  ;;  %v3002_v13 = vrot.slane %v2994_v36, %v4684_v40  ;;  %v2913_v44 = vcombine.high %v2873_v35, %v2905_v33  ;;  %v3041_v45 = vrot.slane %v3027_v41, %v4684_v40 }
 0x188   : > { %v3009_v46 = vrot.slane %v2995_v42, %v4684_v40 }
 0x189   : > { %3091 = vrot.lane.b32.xlu0 %v3045_v15, %s4051_s8  ;;  %3087 = vrot.lane.b32.xlu1 %v3044_v18, %s4052_s9  ;;  %v3046_v43 = vcombine.low %v3002_v13, %v3034_v39  ;;  %v3047_v48 = vcombine.high %v3002_v13, %v3034_v39  ;;  %s268_s8 = sand.u32 1, %s4020_s16  }
 0x18a   : > { %v3048_v47 = vcombine.low %v3009_v46, %v3041_v45  ;;  %v3049_v49 = vcombine.high %v3009_v46, %v3041_v45  ;;  %s4739_s9 = sshll.u32 %s268_s8, 3 }
 0x18d   : > { %3059 = vrot.lane.b32.xlu1 %v2909_v28, %s4053_s12  ;;  %3051 = vrot.lane.b32.xlu0 %v2907_v60, %s4054_s13  ;;  %s3440_s12 = sshll.u32 %s4032_s19, 1  ;;  %s270_s19 = scalar_lea.vmem [#allocation3], %s4739_s9 }
 0x18e   : > { %s3152_s13 = sadd.s32 %s4028_s18, %s3440_s12 }
 0x191   : > { %3063 = vrot.lane.b32.xlu1 %v2910_v31, %s4055_s14  ;;  %3055 = vrot.lane.b32.xlu0 %v2908_v32, %s4056_s10  ;;  %s3441_s14 = sshll.u32 %s3152_s13, 7  ;;  %s3156_s10 = sshll.u32 %s270_s19, 4  ;;  %s3157_s10 = int_to_ptr.vmem [resolvable:$true] %s3156_s10 }
 0x195   : > { %3071 = vrot.lane.b32.xlu1 %v2912_v37, %s4057_s24  ;;  %3067 = vrot.lane.b32.xlu0 %v2911_v38, %s4058_s30  ;;  %s4747_s30 = scalar_lea.hbm %s4799_s4, %s3441_s14 }
 0x199   : > { %3095 = vrot.lane.b32.xlu1 %v3046_v43, %s4059_s5  ;;  %3075 = vrot.lane.b32.xlu0 %v2913_v44, %s4060_s11  ;;  %s3141_s5 = scalar_lea.sflag [#allocation4], %s268_s8  ;;  %s3952_s11 = scalar_lea.vmem %s3157_s10, 128 }
 0x19a   : > { %p3953_p1 = scmp.ne.s32.totalorder %s3157_s10, %s3952_s11 }
 0x19c   : > { %p3954_p2 = pnand %p3953_p1, %p4141_p3 }
 0x19d   : > { %3103 = vrot.lane.b32.xlu1 %v3048_v47, %s4061_s6  ;;  %3099 = vrot.lane.b32.xlu0 %v3047_v48, %s4062_s23  ;;  %s4064_s6 = smov [#allocation3]  }
 0x19e   : > { %p3955_p4 = pneg %p3954_p2  ;;  %s3956_s23 = sshll.u32 %s4064_s6, 4  ;;  %s3957_s23 = int_to_ptr.vmem [resolvable:$false] %s3956_s23 }
 0x19f   : > { %p3959_p5 = scmp.lt.s32.totalorder %s3157_s10, %s3957_s23 }
 0x1a1   : > { %3107 = vrot.lane.b32.xlu0 %v3049_v49, %s4063_s27  ;;  %s3958_s27 = scalar_lea.vmem %s3957_s23, 256 }
 0x1a2   : > { %p3960_p6 = scmp.lt.s32.totalorder %s3958_s27, %s3952_s11 }
 0x1a4   : > { %p3961_p7 = por %p3960_p6, %p3959_p5 }
 0x1a6   : > { %p3962_p9 = pnand %p3961_p7, %p3955_p4 }
 0x1f7   : > { %v3084_v50 = vpop.permute.xlu0 %3083  ;;  %v3080_v51 = vpop.permute.xlu1 %3079 }
 0x1fb   : > { %v3092_v52 = vpop.permute.xlu0 %3091  ;;  %v3088_v53 = vpop.permute.xlu1 %3087 }
 0x1ff   : > { %v3060_v54 = vpop.permute.xlu1 %3059  ;;  %v3052_v55 = vpop.permute.xlu0 %3051 }
 0x200   : > { %v3110_v40 = vsel %vm307_vm2, %v2906_v23, %v3052_v55 }
 0x203   : > { %v3064_v56 = vpop.permute.xlu1 %3063  ;;  %v3056_v57 = vpop.permute.xlu0 %3055 }
 0x204   : > { %v3112_v58 = vsel %vm3111_vm3, %v3110_v40, %v3056_v57 }
 0x205   : > { %v3114_v59 = vsel %vm3113_vm4, %v3112_v58, %v3060_v54 }
 0x206   : > { %v3116_v61 = vsel %vm3115_vm5, %v3114_v59, %v3064_v56 }
 0x207   : > { %v3072_v62 = vpop.permute.xlu1 %3071  ;;  %v3068_v1 = vpop.permute.xlu0 %3067 }
 0x208   : > { %v3118_v2 = vsel %vm3117_vm6, %v3116_v61, %v3068_v1 }
 0x209   : > { %v3120_v4 = vsel %vm3119_vm7, %v3118_v2, %v3072_v62 }
 0x20b   : > { %v3076_v3 = vpop.permute.xlu0 %3075  ;;  %v3096_v5 = vpop.permute.xlu1 %3095 }
 0x20c   : > { %v3122_v7 = vsel %vm3121_vm8, %v3120_v4, %v3076_v3 }
 0x20d   : > { %v3124_v8 = vsel %vm3123_vm9, %v3122_v7, %v3080_v51 }
 0x20e   : > { %v3126_v9 = vsel %vm3125_vm10, %v3124_v8, %v3084_v50 }
 0x20f   : > { %v3100_v10 = vpop.permute.xlu0 %3099  ;;  %v3128_v11 = vsel %vm3127_vm11, %v3126_v9, %v3088_v53  ;;  %v3104_v15 = vpop.permute.xlu1 %3103 }
 0x210   : > { %v3130_v12 = vsel %vm3129_vm12, %v3128_v11, %v3092_v52 }
 0x211   : > { %v3132_v14 = vsel %vm3131_vm13, %v3130_v12, %v3096_v5 }
 0x212   : > { %v3134_v18 = vsel %vm3133_vm14, %v3132_v14, %v3100_v10 }
 0x213   : > { %v3108_v19 = vpop.permute.xlu0 %3107  ;;  %v3136_v20 = vsel %vm3135_vm15, %v3134_v18, %v3104_v15 }
 0x214   : > { %v3138_v21 = vsel %vm3137_vm0, %v3136_v20, %v3108_v19 }
 0x215   : > { %3139 = vst [vmem:[%s270_s19] sm:$0xff] %v3138_v21 }
 0x216   : > { %3965 = shalt.err (!%p3962_p9)
}
 0x217   : > { %s3966_s9 = scalar_lea.hbm %s4747_s30, 128  ;;  %s3970_s13 = scalar_lea.hbm %s4799_s4, 512 }
 0x218   : > { %p3967_p10 = scmp.ne.s32.totalorder %s4747_s30, %s3966_s9  ;;  %p3971_p13 = scmp.lt.s32.totalorder %s4747_s30, %s4799_s4 }
 0x219   : > { %p3972_p0 = scmp.lt.s32.totalorder %s3970_s13, %s3966_s9 }
 0x21a   : > { %p3968_p11 = pnand %p3967_p10, %p4141_p3 }
 0x21b   : > { %p3973_p1 = por %p3972_p0, %p3971_p13 }
 0x21c   : > { %p3969_p12 = pneg %p3968_p11 }
 0x21e   : > { %p3974_p2 = pnand %p3973_p1, %p3969_p12 }
 0x220   : > { %3977 = shalt.err (!%p3974_p2)
}
 0x221   : > { %3863 = dma.vmem_to_hbm [thread:$0]  (%p4141_p3), %s3157_s10, 128, %s4747_s30, %s3141_s5  }
 0x222 PF: > { %p3869_p4 = scmp.ge.s32.totalorder %s4044_s22, 2  ;;  %s3168_s24 = sand.u32 1, %s4016_s15  }
 0x223   : > { %s3169_s18 = scalar_lea.sflag [#allocation4], %s3168_s24 }
 0x224   : > { %p3866_p5 = pnand %p3869_p4, %p4150_p8 }
 0x226   : > { %p3867_p6 = pneg %p3866_p5 }
 0x228   : > { %4011 = dma.done.wait (%p3867_p6), %s3169_s18, 128  }
 0x229   : > { %4013 = vsyncadd (%p3867_p6), %s3169_s18, 4294967168  ;;  %s17_s22 = sadd.s32 1, %s4044_s22   ;;  %s4802_s15 = smov %s4020_s16 }
 0x22a   : > { %p14_p7 = scmp.ge.s32.totalorder %s17_s22, 6   ;;  %s4803_s16 = smov %s4024_s17 }
 0x22b   : > { %s4804_s17 = smov %s4159_s7  ;;  %s4805_s18 = smov %s4036_s20 }
 0x22c   : > { %s4806_s19 = smov %s4040_s21  ;;  %s4807_s20 = smov %s4810_s25 }
 0x22d   : > { %s4808_s21 = smov %s4814_s26  ;;  %16 = sbr.rel (!%p14_p7) target bundleno = 5 (0x5), region = 84 }
 0x232   :  { %3174 = vsyncpa [#allocation4], 1 }
 0x233   :  { %3176 = vsyncpa [#allocation4 + $0x1], 1 }

</bundles_post_ra>
